<compile_context>
chip_gen: v7x
topology: tpu7x:2x2x1
jax: 0.10.0
libtpu: 0.0.40
codegen_flags: <defaults>
</compile_context>

<pallas_src>
import jax
import jax.numpy as jnp
import numpy as np
from jax.experimental import pallas as pl
from jax.experimental.pallas import tpu as pltpu

VERY_NEGATIVE_NUMBER = -1e30


def _lstm_maxpool_linear_kernel(
    x_ref,      # (TC, BB, E)  embedded tokens for this time chunk / batch block
    len_ref,    # (BB, 1)      int32 sequence lengths (0 for padded batch rows)
    wih_ref,    # (E, 4H)      fused input weights, gate order [i, f, g, o]
    bih_ref,    # (1, 4H)      fused bias (b_ih + b_hh)
    whh_ref,    # (4H, 4H)     fused recurrent weights; rows >= H are zero
    wout_ref,   # (4H, CP)     output weights; rows >= H and cols >= C are zero
    bout_ref,   # (1, CP)
    out_ref,    # (BB, CP)     lane-dense logits slab
    xp_ref,     # scratch (TC*BB, 4H)  hoisted input projection for this chunk
    h_ref,      # scratch (BB, 4H)     hidden state (lanes >= H hold bounded garbage)
    c_ref,      # scratch (BB, 4H)     cell state
    pool_ref,   # scratch (BB, 4H)     running max-pool
):
    TC, BB, E = x_ref.shape
    G = whh_ref.shape[0]
    H = G // 4

    c_idx = pl.program_id(1)

    @pl.when(c_idx == 0)
    def _():
        h_ref[...] = jnp.zeros_like(h_ref)
        c_ref[...] = jnp.zeros_like(c_ref)
        pool_ref[...] = jnp.full_like(pool_ref, -jnp.inf)

    # --- Hoisted input projection: ONE lane-dense MXU matmul for the whole chunk.
    x2d = x_ref[...].reshape(TC * BB, E)
    xp_ref[...] = (
        jnp.dot(x2d, wih_ref[...], preferred_element_type=jnp.float32)
        + bih_ref[...]
    )

    # Loop-invariant operands.
    whh = whh_ref[...]                                   # (4H, 4H)
    lens = len_ref[...]                                  # (BB, 1) int32
    lane = jax.lax.broadcasted_iota(jnp.int32, (BB, G), 1)
    g_lane = (lane >= 2 * H) & (lane < 3 * H)            # lanes holding gate `g`
    t_base = c_idx * TC

    def step(s, carry):
        h, c, pool = carry
        row = pl.ds(pl.multiple_of(s * BB, BB), BB)      # sublane-aligned slice
        # ONE recurrent MXU push per step; zero rows of whh kill garbage lanes of h.
        gates = xp_ref[row, :] + jnp.dot(h, whh, preferred_element_type=jnp.float32)
        # Full-vreg activations (EUP): sigmoid via tanh; select tanh for gate `g`.
        tanh_all = jnp.tanh(gates)
        sig_all = 0.5 * (1.0 + jnp.tanh(0.5 * gates))
        act = jnp.where(g_lane, tanh_all, sig_all)       # [σ(i)|σ(f)|tanh(g)|σ(o)]
        # XLU rolls align the gates to lane group 0 (only group 0 is meaningful).
        ig = act * pltpu.roll(act, shift=2 * H, axis=1)  # group0: σ(i)*tanh(g)
        f_al = pltpu.roll(act, shift=3 * H, axis=1)      # group0: σ(f)
        o_al = pltpu.roll(act, shift=H, axis=1)          # group0: σ(o)
        c_new = f_al * c + ig
        h_new = o_al * jnp.tanh(c_new)
        # exp_mask: add (1 - mask) * VERY_NEGATIVE_NUMBER, then running max over t.
        valid = (lens > (t_base + s)).astype(jnp.float32)      # (BB, 1)
        pool = jnp.maximum(pool, h_new + (1.0 - valid) * VERY_NEGATIVE_NUMBER)
        return h_new, c_new, pool

    carry0 = (h_ref[...], c_ref[...], pool_ref[...])
    h, c, pool = jax.lax.fori_loop(0, TC, step, carry0, unroll=min(TC, 8))
    h_ref[...] = h
    c_ref[...] = c
    pool_ref[...] = pool

    @pl.when(c_idx == pl.num_programs(1) - 1)
    def _():
        # Zero padded batch rows (length 0) so their ~-1e30 pool cannot blow up the
        # output matmul; zero rows/cols of wout_pad kill the garbage lane groups.
        pooled = jnp.where(len_ref[...] > 0, pool_ref[...], 0.0)
        out_ref[...] = (
            jnp.dot(pooled, wout_ref[...], preferred_element_type=jnp.float32)
            + bout_ref[...]
        )


def model_forward(token_ids, lengths, params, *, time_chunk=8):
    """token_ids: (T, B) int32; lengths: (B,) int32; returns logits (B, C)."""
    T, B = token_ids.shape
    emb = params["embed"]          # (V, E)
    wih = params["wih"]            # (E, 4H)  gate order [i, f, g, o]
    whh = params["whh"]            # (H, 4H)
    bias = params["bias"]          # (1, 4H)  (b_ih + b_hh)
    wout = params["wout"]          # (H, C)
    bout = params["bout"]          # (1, C)
    E = emb.shape[1]
    H = whh.shape[0]
    C = wout.shape[1]
    G = 4 * H

    # Pad batch to the f32 sublane tile (8); padded rows get length 0.
    BP = max(8, ((B + 7) // 8) * 8)
    if BP > 128:                       # shard large batches across TensorCores
        BP = ((BP + 127) // 128) * 128
        BB = 128
    else:
        BB = BP
    NB = BP // BB

    # Pad time to a multiple of the chunk; padded steps are masked out of the pool.
    TC = time_chunk
    T_pad = ((T + TC - 1) // TC) * TC
    NCHUNK = T_pad // TC

    tok_p = jnp.pad(token_ids, ((0, T_pad - T), (0, BP - B)))
    len_p = jnp.pad(lengths.astype(jnp.int32), ((0, BP - B),)).reshape(BP, 1)

    # TODO(synk): embedding row-gather stays in the XLA wrapper (jnp.take); an
    # in-kernel gather (scalar-prefetch ids + per-row DMA) is left for future work.
    x_emb = jnp.take(emb, tok_p, axis=0).astype(jnp.float32)    # (T_pad, BP, E)

    # Zero-pad recurrent / output weights along the row dim to 4H so the hidden
    # state can stay in the fused (BB, 4H) lane layout (garbage lane groups are
    # annihilated by the zero rows).  Pad C to 128 for a lane-dense output store.
    whh_pad = jnp.zeros((G, G), jnp.float32).at[:H].set(whh)
    CP = ((C + 127) // 128) * 128
    wout_pad = jnp.zeros((G, CP), jnp.float32).at[:H, :C].set(wout)
    bout_pad = jnp.zeros((1, CP), jnp.float32).at[:, :C].set(bout)

    logits_pad = pl.pallas_call(
        _lstm_maxpool_linear_kernel,
        out_shape=jax.ShapeDtypeStruct((BP, CP), jnp.float32),
        grid_spec=pltpu.PrefetchScalarGridSpec(
            num_scalar_prefetch=0,
            grid=(NB, NCHUNK),                       # (batch blocks, time chunks)
            in_specs=[
                pl.BlockSpec((TC, BB, E), lambda b, c: (c, b, 0)),
                pl.BlockSpec((BB, 1), lambda b, c: (b, 0)),
                pl.BlockSpec((E, G), lambda b, c: (0, 0)),
                pl.BlockSpec((1, G), lambda b, c: (0, 0)),
                pl.BlockSpec((G, G), lambda b, c: (0, 0)),
                pl.BlockSpec((G, CP), lambda b, c: (0, 0)),
                pl.BlockSpec((1, CP), lambda b, c: (0, 0)),
            ],
            out_specs=pl.BlockSpec((BB, CP), lambda b, c: (b, 0)),
            scratch_shapes=[
                pltpu.VMEM((TC * BB, G), jnp.float32),   # hoisted projection
                pltpu.VMEM((BB, G), jnp.float32),        # h
                pltpu.VMEM((BB, G), jnp.float32),        # c
                pltpu.VMEM((BB, G), jnp.float32),        # pool
            ],
        ),
        compiler_params=pltpu.CompilerParams(
            dimension_semantics=("parallel", "arbitrary"),
            vmem_limit_bytes=48 * 1024 * 1024,           # < v7x 64 MiB physical
        ),
    )(x_emb, len_p, wih, bias, whh_pad, wout_pad, bout_pad)

    return logits_pad[:B, :C]


def _reference_forward(token_ids, lengths, params):
    """Pure-JAX reference (lax.scan LSTM) for correctness checking."""
    emb = params["embed"]
    wih, whh, bias = params["wih"], params["whh"], params["bias"]
    wout, bout = params["wout"], params["bout"]
    H = whh.shape[0]
    T, B = token_ids.shape

    x_emb = jnp.take(emb, token_ids, axis=0)

    def step(carry, x_t):
        h, c = carry
        gates = x_t @ wih + h @ whh + bias
        i = jax.nn.sigmoid(gates[:, 0 * H:1 * H])
        f = jax.nn.sigmoid(gates[:, 1 * H:2 * H])
        g = jnp.tanh(gates[:, 2 * H:3 * H])
        o = jax.nn.sigmoid(gates[:, 3 * H:4 * H])
        c = f * c + i * g
        h = o * jnp.tanh(c)
        return (h, c), h

    h0 = jnp.zeros((B, H), jnp.float32)
    _, outputs = jax.lax.scan(step, (h0, h0), x_emb)       # (T, B, H)

    time_idx = jnp.arange(T, dtype=jnp.int32)[:, None]
    mask = (time_idx < lengths[None, :]).astype(jnp.float32)[:, :, None]
    masked = outputs + (1.0 - mask) * VERY_NEGATIVE_NUMBER
    pooled = jnp.max(masked, axis=0)
    return pooled @ wout + bout


if __name__ == "__main__":
    # Small, deterministic configuration.
    VOCAB = 50
    EMB_DIM = 16
    HIDDEN = 32
    NCLASSES = 5
    T, B = 8, 4

    key = jax.random.PRNGKey(0)
    keys = jax.random.split(key, 8)

    params = {
        "embed": jax.random.normal(keys[0], (VOCAB, EMB_DIM), jnp.float32) * 0.1,
        # PyTorch stores W_ih:(4H,E), W_hh:(4H,H); we keep transposed copies.
        "wih": jax.random.normal(keys[1], (EMB_DIM, 4 * HIDDEN), jnp.float32) * 0.1,
        "whh": jax.random.normal(keys[2], (HIDDEN, 4 * HIDDEN), jnp.float32) * 0.1,
        "bias": (jax.random.normal(keys[3], (1, 4 * HIDDEN), jnp.float32) * 0.1
                 + jax.random.normal(keys[4], (1, 4 * HIDDEN), jnp.float32) * 0.1),
        "wout": jax.random.normal(keys[5], (HIDDEN, NCLASSES), jnp.float32) * 0.1,
        "bout": jax.random.normal(keys[6], (1, NCLASSES), jnp.float32) * 0.1,
    }

    token_ids = jax.random.randint(keys[7], (T, B), 0, VOCAB, dtype=jnp.int32)
    lengths = jnp.array([8, 6, 5, 3], dtype=jnp.int32)  # sorted desc, like pack_padded

    logits = model_forward(token_ids, lengths, params)
    logits = jax.block_until_ready(logits)

    ref = jax.block_until_ready(_reference_forward(token_ids, lengths, params))
    np.testing.assert_allclose(np.asarray(logits), np.asarray(ref),
                               rtol=5e-5, atol=5e-5)

    print("KERNEL_OK")
</pallas_src>

<mosaic_0001>
module attributes {stable_mosaic.version = 11 : i64} {
  func.func @_lstm_maxpool_linear_kernel(%arg0: i32, %arg1: i32, %arg2: memref<8x8x16xf32, #tpu.memory_space<vmem>>, %arg3: memref<8x1xi32, #tpu.memory_space<vmem>>, %arg4: memref<16x128xf32, #tpu.memory_space<vmem>>, %arg5: memref<1x128xf32, #tpu.memory_space<vmem>>, %arg6: memref<128x128xf32, #tpu.memory_space<vmem>>, %arg7: memref<128x128xf32, #tpu.memory_space<vmem>>, %arg8: memref<1x128xf32, #tpu.memory_space<vmem>>, %arg9: memref<8x128xf32, #tpu.memory_space<vmem>>, %arg10: memref<64x128xf32, #tpu.memory_space<vmem>>, %arg11: memref<8x128xf32, #tpu.memory_space<vmem>>, %arg12: memref<8x128xf32, #tpu.memory_space<vmem>>, %arg13: memref<8x128xf32, #tpu.memory_space<vmem>>) attributes {dimension_semantics = [#tpu.dimension_semantics<parallel>, #tpu.dimension_semantics<arbitrary>], iteration_bounds = array<i64: 1, 1>, scalar_prefetch = 0 : i64, scratch_operands = 4 : i64, tpu.core_type = #tpu.core_type<tc>, window_params = [{transform_indices = @transform_0, window_bounds = array<i64: 8, 8, 16>}, {transform_indices = @transform_1, window_bounds = array<i64: 8, 1>}, {pipeline_mode = #tpu.pipeline_mode<synchronous>, transform_indices = @transform_2, window_bounds = array<i64: 16, 128>}, {pipeline_mode = #tpu.pipeline_mode<synchronous>, transform_indices = @transform_3, window_bounds = array<i64: 1, 128>}, {pipeline_mode = #tpu.pipeline_mode<synchronous>, transform_indices = @transform_4, window_bounds = array<i64: 128, 128>}, {pipeline_mode = #tpu.pipeline_mode<synchronous>, transform_indices = @transform_5, window_bounds = array<i64: 128, 128>}, {pipeline_mode = #tpu.pipeline_mode<synchronous>, transform_indices = @transform_6, window_bounds = array<i64: 1, 128>}, {transform_indices = @transform_7, window_bounds = array<i64: 8, 128>}]} {
    %c0_i32 = arith.constant 0 : i32
    %0 = arith.cmpi eq, %arg1, %c0_i32 : i32
    %1 = arith.extui %0 : i1 to i32
    %c0_i32_0 = arith.constant 0 : i32
    %2 = arith.cmpi ne, %1, %c0_i32_0 : i32
    scf.if %2 {
      %cst_116 = arith.constant 0.000000e+00 : f32
      %309 = vector.broadcast %cst_116 : f32 to vector<8x128xf32>
      %c0_117 = arith.constant 0 : index
      %c0_118 = arith.constant 0 : index
      %310 = vector.load %arg11[%c0_117, %c0_118] : memref<8x128xf32, #tpu.memory_space<vmem>>, vector<8x128xf32>
      tpu.vector_store %arg11[%c0_117, %c0_118], %309 {strides = array<i32>} : memref<8x128xf32, #tpu.memory_space<vmem>>, vector<8x128xf32>,
      %cst_119 = arith.constant 0.000000e+00 : f32
      %311 = vector.broadcast %cst_119 : f32 to vector<8x128xf32>
      %c0_120 = arith.constant 0 : index
      %c0_121 = arith.constant 0 : index
      %312 = vector.load %arg12[%c0_120, %c0_121] : memref<8x128xf32, #tpu.memory_space<vmem>>, vector<8x128xf32>
      tpu.vector_store %arg12[%c0_120, %c0_121], %311 {strides = array<i32>} : memref<8x128xf32, #tpu.memory_space<vmem>>, vector<8x128xf32>,
      %cst_122 = arith.constant 0xFF800000 : f32
      %313 = vector.broadcast %cst_122 : f32 to vector<8x128xf32>
      %c0_123 = arith.constant 0 : index
      %c0_124 = arith.constant 0 : index
      %314 = vector.load %arg13[%c0_123, %c0_124] : memref<8x128xf32, #tpu.memory_space<vmem>>, vector<8x128xf32>
      tpu.vector_store %arg13[%c0_123, %c0_124], %313 {strides = array<i32>} : memref<8x128xf32, #tpu.memory_space<vmem>>, vector<8x128xf32>,
    } else {
    }
    %c0 = arith.constant 0 : index
    %c0_1 = arith.constant 0 : index
    %c0_2 = arith.constant 0 : index
    %3 = vector.load %arg2[%c0, %c0_1, %c0_2] : memref<8x8x16xf32, #tpu.memory_space<vmem>>, vector<8x8x16xf32>
    %4 = vector.shape_cast %3 : vector<8x8x16xf32> to vector<64x16xf32>
    %c0_3 = arith.constant 0 : index
    %c0_4 = arith.constant 0 : index
    %5 = vector.load %arg4[%c0_3, %c0_4] : memref<16x128xf32, #tpu.memory_space<vmem>>, vector<16x128xf32>
    %cst = arith.constant dense<0.000000e+00> : vector<64x128xf32>
    %6 = tpu.matmul %4, %5, %cst {dimension_numbers = #tpu.dot_dimension_numbers<[1], [0], [0], [1], [0, 0, 1, 1], [], []>} : vector<64x16xf32>, vector<16x128xf32>, vector<64x128xf32> -> vector<64x128xf32>
    %c0_5 = arith.constant 0 : index
    %c0_6 = arith.constant 0 : index
    %7 = vector.load %arg5[%c0_5, %c0_6] : memref<1x128xf32, #tpu.memory_space<vmem>>, vector<1x128xf32>
    %8 = vector.broadcast %7 : vector<1x128xf32> to vector<64x128xf32>
    %9 = arith.addf %6, %8 : vector<64x128xf32>
    %c0_7 = arith.constant 0 : index
    %c0_8 = arith.constant 0 : index
    %10 = vector.load %arg10[%c0_7, %c0_8] : memref<64x128xf32, #tpu.memory_space<vmem>>, vector<64x128xf32>
    tpu.vector_store %arg10[%c0_7, %c0_8], %9 {strides = array<i32>} : memref<64x128xf32, #tpu.memory_space<vmem>>, vector<64x128xf32>,
    %c0_9 = arith.constant 0 : index
    %c0_10 = arith.constant 0 : index
    %11 = vector.load %arg6[%c0_9, %c0_10] : memref<128x128xf32, #tpu.memory_space<vmem>>, vector<128x128xf32>
    %c0_11 = arith.constant 0 : index
    %c0_12 = arith.constant 0 : index
    %12 = vector.load %arg3[%c0_11, %c0_12] : memref<8x1xi32, #tpu.memory_space<vmem>>, vector<8x1xi32>
    %13 = tpu.iota {dimensions = array<i32: 1>} : vector<8x128xi32>
    %c64_i32 = arith.constant 64 : i32
    %14 = vector.broadcast %c64_i32 : i32 to vector<8x128xi32>
    %15 = arith.cmpi sge, %13, %14 : vector<8x128xi32>
    %c96_i32 = arith.constant 96 : i32
    %16 = vector.broadcast %c96_i32 : i32 to vector<8x128xi32>
    %17 = arith.cmpi slt, %13, %16 : vector<8x128xi32>
    %18 = arith.andi %15, %17 : vector<8x128xi1>
    %c8_i32 = arith.constant 8 : i32
    %19 = arith.muli %arg1, %c8_i32 : i32
    %c0_13 = arith.constant 0 : index
    %c0_14 = arith.constant 0 : index
    %20 = vector.load %arg11[%c0_13, %c0_14] : memref<8x128xf32, #tpu.memory_space<vmem>>, vector<8x128xf32>
    %c0_15 = arith.constant 0 : index
    %c0_16 = arith.constant 0 : index
    %21 = vector.load %arg12[%c0_15, %c0_16] : memref<8x128xf32, #tpu.memory_space<vmem>>, vector<8x128xf32>
    %c0_17 = arith.constant 0 : index
    %c0_18 = arith.constant 0 : index
    %22 = vector.load %arg13[%c0_17, %c0_18] : memref<8x128xf32, #tpu.memory_space<vmem>>, vector<8x128xf32>
    %c0_i32_19 = arith.constant 0 : i32
    %c8_i32_20 = arith.constant 8 : i32
    %23 = arith.muli %c0_i32_19, %c8_i32_20 : i32
    %24 = tpu.assume_multiple %23, 8 : i32
    %25 = arith.index_cast %24 : i32 to index
    %c0_21 = arith.constant 0 : index
    %26 = vector.load %arg10[%25, %c0_21] : memref<64x128xf32, #tpu.memory_space<vmem>>, vector<8x128xf32>
    %cst_22 = arith.constant dense<0.000000e+00> : vector<8x128xf32>
    %27 = tpu.matmul %20, %11, %cst_22 {dimension_numbers = #tpu.dot_dimension_numbers<[1], [0], [0], [1], [0, 0, 1, 1], [], []>} : vector<8x128xf32>, vector<128x128xf32>, vector<8x128xf32> -> vector<8x128xf32>
    %28 = arith.addf %26, %27 : vector<8x128xf32>
    %29 = math.tanh %28 : vector<8x128xf32>
    %cst_23 = arith.constant 5.000000e-01 : f32
    %30 = vector.broadcast %cst_23 : f32 to vector<8x128xf32>
    %31 = arith.mulf %30, %28 : vector<8x128xf32>
    %32 = math.tanh %31 : vector<8x128xf32>
    %cst_24 = arith.constant 1.000000e+00 : f32
    %33 = vector.broadcast %cst_24 : f32 to vector<8x128xf32>
    %34 = arith.addf %33, %32 : vector<8x128xf32>
    %cst_25 = arith.constant 5.000000e-01 : f32
    %35 = vector.broadcast %cst_25 : f32 to vector<8x128xf32>
    %36 = arith.mulf %35, %34 : vector<8x128xf32>
    %37 = arith.select %18, %29, %36 : vector<8x128xi1>, vector<8x128xf32>
    %c64_i32_26 = arith.constant 64 : i32
    %38 = tpu.dynamic_rotate %37 by %c64_i32_26 dim 1 : vector<8x128xf32>, i32 -> vector<8x128xf32>
    %39 = arith.mulf %37, %38 : vector<8x128xf32>
    %c96_i32_27 = arith.constant 96 : i32
    %40 = tpu.dynamic_rotate %37 by %c96_i32_27 dim 1 : vector<8x128xf32>, i32 -> vector<8x128xf32>
    %c32_i32 = arith.constant 32 : i32
    %41 = tpu.dynamic_rotate %37 by %c32_i32 dim 1 : vector<8x128xf32>, i32 -> vector<8x128xf32>
    %42 = arith.mulf %40, %21 : vector<8x128xf32>
    %43 = arith.addf %42, %39 : vector<8x128xf32>
    %44 = math.tanh %43 : vector<8x128xf32>
    %45 = arith.mulf %41, %44 : vector<8x128xf32>
    %46 = arith.addi %19, %c0_i32_19 : i32
    %47 = vector.broadcast %46 : i32 to vector<8x1xi32>
    %48 = arith.cmpi sgt, %12, %47 : vector<8x1xi32>
    %49 = arith.extui %48 : vector<8x1xi1> to vector<8x1xi32>
    %50 = arith.sitofp %49 : vector<8x1xi32> to vector<8x1xf32>
    %cst_28 = arith.constant 1.000000e+00 : f32
    %51 = vector.broadcast %cst_28 : f32 to vector<8x1xf32>
    %52 = arith.subf %51, %50 : vector<8x1xf32>
    %cst_29 = arith.constant -1.000000e+30 : f32
    %53 = vector.broadcast %cst_29 : f32 to vector<8x1xf32>
    %54 = arith.mulf %52, %53 : vector<8x1xf32>
    %55 = vector.broadcast %54 : vector<8x1xf32> to vector<8x128xf32>
    %56 = arith.addf %45, %55 : vector<8x128xf32>
    %57 = arith.maximumf %22, %56 : vector<8x128xf32>
    %c1_i32 = arith.constant 1 : i32
    %c8_i32_30 = arith.constant 8 : i32
    %58 = arith.muli %c1_i32, %c8_i32_30 : i32
    %59 = tpu.assume_multiple %58, 8 : i32
    %60 = arith.index_cast %59 : i32 to index
    %c0_31 = arith.constant 0 : index
    %61 = vector.load %arg10[%60, %c0_31] : memref<64x128xf32, #tpu.memory_space<vmem>>, vector<8x128xf32>
    %cst_32 = arith.constant dense<0.000000e+00> : vector<8x128xf32>
    %62 = tpu.matmul %45, %11, %cst_32 {dimension_numbers = #tpu.dot_dimension_numbers<[1], [0], [0], [1], [0, 0, 1, 1], [], []>} : vector<8x128xf32>, vector<128x128xf32>, vector<8x128xf32> -> vector<8x128xf32>
    %63 = arith.addf %61, %62 : vector<8x128xf32>
    %64 = math.tanh %63 : vector<8x128xf32>
    %cst_33 = arith.constant 5.000000e-01 : f32
    %65 = vector.broadcast %cst_33 : f32 to vector<8x128xf32>
    %66 = arith.mulf %65, %63 : vector<8x128xf32>
    %67 = math.tanh %66 : vector<8x128xf32>
    %cst_34 = arith.constant 1.000000e+00 : f32
    %68 = vector.broadcast %cst_34 : f32 to vector<8x128xf32>
    %69 = arith.addf %68, %67 : vector<8x128xf32>
    %cst_35 = arith.constant 5.000000e-01 : f32
    %70 = vector.broadcast %cst_35 : f32 to vector<8x128xf32>
    %71 = arith.mulf %70, %69 : vector<8x128xf32>
    %72 = arith.select %18, %64, %71 : vector<8x128xi1>, vector<8x128xf32>
    %c64_i32_36 = arith.constant 64 : i32
    %73 = tpu.dynamic_rotate %72 by %c64_i32_36 dim 1 : vector<8x128xf32>, i32 -> vector<8x128xf32>
    %74 = arith.mulf %72, %73 : vector<8x128xf32>
    %c96_i32_37 = arith.constant 96 : i32
    %75 = tpu.dynamic_rotate %72 by %c96_i32_37 dim 1 : vector<8x128xf32>, i32 -> vector<8x128xf32>
    %c32_i32_38 = arith.constant 32 : i32
    %76 = tpu.dynamic_rotate %72 by %c32_i32_38 dim 1 : vector<8x128xf32>, i32 -> vector<8x128xf32>
    %77 = arith.mulf %75, %43 : vector<8x128xf32>
    %78 = arith.addf %77, %74 : vector<8x128xf32>
    %79 = math.tanh %78 : vector<8x128xf32>
    %80 = arith.mulf %76, %79 : vector<8x128xf32>
    %81 = arith.addi %19, %c1_i32 : i32
    %82 = vector.broadcast %81 : i32 to vector<8x1xi32>
    %83 = arith.cmpi sgt, %12, %82 : vector<8x1xi32>
    %84 = arith.extui %83 : vector<8x1xi1> to vector<8x1xi32>
    %85 = arith.sitofp %84 : vector<8x1xi32> to vector<8x1xf32>
    %cst_39 = arith.constant 1.000000e+00 : f32
    %86 = vector.broadcast %cst_39 : f32 to vector<8x1xf32>
    %87 = arith.subf %86, %85 : vector<8x1xf32>
    %cst_40 = arith.constant -1.000000e+30 : f32
    %88 = vector.broadcast %cst_40 : f32 to vector<8x1xf32>
    %89 = arith.mulf %87, %88 : vector<8x1xf32>
    %90 = vector.broadcast %89 : vector<8x1xf32> to vector<8x128xf32>
    %91 = arith.addf %80, %90 : vector<8x128xf32>
    %92 = arith.maximumf %57, %91 : vector<8x128xf32>
    %c2_i32 = arith.constant 2 : i32
    %c8_i32_41 = arith.constant 8 : i32
    %93 = arith.muli %c2_i32, %c8_i32_41 : i32
    %94 = tpu.assume_multiple %93, 8 : i32
    %95 = arith.index_cast %94 : i32 to index
    %c0_42 = arith.constant 0 : index
    %96 = vector.load %arg10[%95, %c0_42] : memref<64x128xf32, #tpu.memory_space<vmem>>, vector<8x128xf32>
    %cst_43 = arith.constant dense<0.000000e+00> : vector<8x128xf32>
    %97 = tpu.matmul %80, %11, %cst_43 {dimension_numbers = #tpu.dot_dimension_numbers<[1], [0], [0], [1], [0, 0, 1, 1], [], []>} : vector<8x128xf32>, vector<128x128xf32>, vector<8x128xf32> -> vector<8x128xf32>
    %98 = arith.addf %96, %97 : vector<8x128xf32>
    %99 = math.tanh %98 : vector<8x128xf32>
    %cst_44 = arith.constant 5.000000e-01 : f32
    %100 = vector.broadcast %cst_44 : f32 to vector<8x128xf32>
    %101 = arith.mulf %100, %98 : vector<8x128xf32>
    %102 = math.tanh %101 : vector<8x128xf32>
    %cst_45 = arith.constant 1.000000e+00 : f32
    %103 = vector.broadcast %cst_45 : f32 to vector<8x128xf32>
    %104 = arith.addf %103, %102 : vector<8x128xf32>
    %cst_46 = arith.constant 5.000000e-01 : f32
    %105 = vector.broadcast %cst_46 : f32 to vector<8x128xf32>
    %106 = arith.mulf %105, %104 : vector<8x128xf32>
    %107 = arith.select %18, %99, %106 : vector<8x128xi1>, vector<8x128xf32>
    %c64_i32_47 = arith.constant 64 : i32
    %108 = tpu.dynamic_rotate %107 by %c64_i32_47 dim 1 : vector<8x128xf32>, i32 -> vector<8x128xf32>
    %109 = arith.mulf %107, %108 : vector<8x128xf32>
    %c96_i32_48 = arith.constant 96 : i32
    %110 = tpu.dynamic_rotate %107 by %c96_i32_48 dim 1 : vector<8x128xf32>, i32 -> vector<8x128xf32>
    %c32_i32_49 = arith.constant 32 : i32
    %111 = tpu.dynamic_rotate %107 by %c32_i32_49 dim 1 : vector<8x128xf32>, i32 -> vector<8x128xf32>
    %112 = arith.mulf %110, %78 : vector<8x128xf32>
    %113 = arith.addf %112, %109 : vector<8x128xf32>
    %114 = math.tanh %113 : vector<8x128xf32>
    %115 = arith.mulf %111, %114 : vector<8x128xf32>
    %116 = arith.addi %19, %c2_i32 : i32
    %117 = vector.broadcast %116 : i32 to vector<8x1xi32>
    %118 = arith.cmpi sgt, %12, %117 : vector<8x1xi32>
    %119 = arith.extui %118 : vector<8x1xi1> to vector<8x1xi32>
    %120 = arith.sitofp %119 : vector<8x1xi32> to vector<8x1xf32>
    %cst_50 = arith.constant 1.000000e+00 : f32
    %121 = vector.broadcast %cst_50 : f32 to vector<8x1xf32>
    %122 = arith.subf %121, %120 : vector<8x1xf32>
    %cst_51 = arith.constant -1.000000e+30 : f32
    %123 = vector.broadcast %cst_51 : f32 to vector<8x1xf32>
    %124 = arith.mulf %122, %123 : vector<8x1xf32>
    %125 = vector.broadcast %124 : vector<8x1xf32> to vector<8x128xf32>
    %126 = arith.addf %115, %125 : vector<8x128xf32>
    %127 = arith.maximumf %92, %126 : vector<8x128xf32>
    %c3_i32 = arith.constant 3 : i32
    %c8_i32_52 = arith.constant 8 : i32
    %128 = arith.muli %c3_i32, %c8_i32_52 : i32
    %129 = tpu.assume_multiple %128, 8 : i32
    %130 = arith.index_cast %129 : i32 to index
    %c0_53 = arith.constant 0 : index
    %131 = vector.load %arg10[%130, %c0_53] : memref<64x128xf32, #tpu.memory_space<vmem>>, vector<8x128xf32>
    %cst_54 = arith.constant dense<0.000000e+00> : vector<8x128xf32>
    %132 = tpu.matmul %115, %11, %cst_54 {dimension_numbers = #tpu.dot_dimension_numbers<[1], [0], [0], [1], [0, 0, 1, 1], [], []>} : vector<8x128xf32>, vector<128x128xf32>, vector<8x128xf32> -> vector<8x128xf32>
    %133 = arith.addf %131, %132 : vector<8x128xf32>
    %134 = math.tanh %133 : vector<8x128xf32>
    %cst_55 = arith.constant 5.000000e-01 : f32
    %135 = vector.broadcast %cst_55 : f32 to vector<8x128xf32>
    %136 = arith.mulf %135, %133 : vector<8x128xf32>
    %137 = math.tanh %136 : vector<8x128xf32>
    %cst_56 = arith.constant 1.000000e+00 : f32
    %138 = vector.broadcast %cst_56 : f32 to vector<8x128xf32>
    %139 = arith.addf %138, %137 : vector<8x128xf32>
    %cst_57 = arith.constant 5.000000e-01 : f32
    %140 = vector.broadcast %cst_57 : f32 to vector<8x128xf32>
    %141 = arith.mulf %140, %139 : vector<8x128xf32>
    %142 = arith.select %18, %134, %141 : vector<8x128xi1>, vector<8x128xf32>
    %c64_i32_58 = arith.constant 64 : i32
    %143 = tpu.dynamic_rotate %142 by %c64_i32_58 dim 1 : vector<8x128xf32>, i32 -> vector<8x128xf32>
    %144 = arith.mulf %142, %143 : vector<8x128xf32>
    %c96_i32_59 = arith.constant 96 : i32
    %145 = tpu.dynamic_rotate %142 by %c96_i32_59 dim 1 : vector<8x128xf32>, i32 -> vector<8x128xf32>
    %c32_i32_60 = arith.constant 32 : i32
    %146 = tpu.dynamic_rotate %142 by %c32_i32_60 dim 1 : vector<8x128xf32>, i32 -> vector<8x128xf32>
    %147 = arith.mulf %145, %113 : vector<8x128xf32>
    %148 = arith.addf %147, %144 : vector<8x128xf32>
    %149 = math.tanh %148 : vector<8x128xf32>
    %150 = arith.mulf %146, %149 : vector<8x128xf32>
    %151 = arith.addi %19, %c3_i32 : i32
    %152 = vector.broadcast %151 : i32 to vector<8x1xi32>
    %153 = arith.cmpi sgt, %12, %152 : vector<8x1xi32>
    %154 = arith.extui %153 : vector<8x1xi1> to vector<8x1xi32>
    %155 = arith.sitofp %154 : vector<8x1xi32> to vector<8x1xf32>
    %cst_61 = arith.constant 1.000000e+00 : f32
    %156 = vector.broadcast %cst_61 : f32 to vector<8x1xf32>
    %157 = arith.subf %156, %155 : vector<8x1xf32>
    %cst_62 = arith.constant -1.000000e+30 : f32
    %158 = vector.broadcast %cst_62 : f32 to vector<8x1xf32>
    %159 = arith.mulf %157, %158 : vector<8x1xf32>
    %160 = vector.broadcast %159 : vector<8x1xf32> to vector<8x128xf32>
    %161 = arith.addf %150, %160 : vector<8x128xf32>
    %162 = arith.maximumf %127, %161 : vector<8x128xf32>
    %c4_i32 = arith.constant 4 : i32
    %c8_i32_63 = arith.constant 8 : i32
    %163 = arith.muli %c4_i32, %c8_i32_63 : i32
    %164 = tpu.assume_multiple %163, 8 : i32
    %165 = arith.index_cast %164 : i32 to index
    %c0_64 = arith.constant 0 : index
    %166 = vector.load %arg10[%165, %c0_64] : memref<64x128xf32, #tpu.memory_space<vmem>>, vector<8x128xf32>
    %cst_65 = arith.constant dense<0.000000e+00> : vector<8x128xf32>
    %167 = tpu.matmul %150, %11, %cst_65 {dimension_numbers = #tpu.dot_dimension_numbers<[1], [0], [0], [1], [0, 0, 1, 1], [], []>} : vector<8x128xf32>, vector<128x128xf32>, vector<8x128xf32> -> vector<8x128xf32>
    %168 = arith.addf %166, %167 : vector<8x128xf32>
    %169 = math.tanh %168 : vector<8x128xf32>
    %cst_66 = arith.constant 5.000000e-01 : f32
    %170 = vector.broadcast %cst_66 : f32 to vector<8x128xf32>
    %171 = arith.mulf %170, %168 : vector<8x128xf32>
    %172 = math.tanh %171 : vector<8x128xf32>
    %cst_67 = arith.constant 1.000000e+00 : f32
    %173 = vector.broadcast %cst_67 : f32 to vector<8x128xf32>
    %174 = arith.addf %173, %172 : vector<8x128xf32>
    %cst_68 = arith.constant 5.000000e-01 : f32
    %175 = vector.broadcast %cst_68 : f32 to vector<8x128xf32>
    %176 = arith.mulf %175, %174 : vector<8x128xf32>
    %177 = arith.select %18, %169, %176 : vector<8x128xi1>, vector<8x128xf32>
    %c64_i32_69 = arith.constant 64 : i32
    %178 = tpu.dynamic_rotate %177 by %c64_i32_69 dim 1 : vector<8x128xf32>, i32 -> vector<8x128xf32>
    %179 = arith.mulf %177, %178 : vector<8x128xf32>
    %c96_i32_70 = arith.constant 96 : i32
    %180 = tpu.dynamic_rotate %177 by %c96_i32_70 dim 1 : vector<8x128xf32>, i32 -> vector<8x128xf32>
    %c32_i32_71 = arith.constant 32 : i32
    %181 = tpu.dynamic_rotate %177 by %c32_i32_71 dim 1 : vector<8x128xf32>, i32 -> vector<8x128xf32>
    %182 = arith.mulf %180, %148 : vector<8x128xf32>
    %183 = arith.addf %182, %179 : vector<8x128xf32>
    %184 = math.tanh %183 : vector<8x128xf32>
    %185 = arith.mulf %181, %184 : vector<8x128xf32>
    %186 = arith.addi %19, %c4_i32 : i32
    %187 = vector.broadcast %186 : i32 to vector<8x1xi32>
    %188 = arith.cmpi sgt, %12, %187 : vector<8x1xi32>
    %189 = arith.extui %188 : vector<8x1xi1> to vector<8x1xi32>
    %190 = arith.sitofp %189 : vector<8x1xi32> to vector<8x1xf32>
    %cst_72 = arith.constant 1.000000e+00 : f32
    %191 = vector.broadcast %cst_72 : f32 to vector<8x1xf32>
    %192 = arith.subf %191, %190 : vector<8x1xf32>
    %cst_73 = arith.constant -1.000000e+30 : f32
    %193 = vector.broadcast %cst_73 : f32 to vector<8x1xf32>
    %194 = arith.mulf %192, %193 : vector<8x1xf32>
    %195 = vector.broadcast %194 : vector<8x1xf32> to vector<8x128xf32>
    %196 = arith.addf %185, %195 : vector<8x128xf32>
    %197 = arith.maximumf %162, %196 : vector<8x128xf32>
    %c5_i32 = arith.constant 5 : i32
    %c8_i32_74 = arith.constant 8 : i32
    %198 = arith.muli %c5_i32, %c8_i32_74 : i32
    %199 = tpu.assume_multiple %198, 8 : i32
    %200 = arith.index_cast %199 : i32 to index
    %c0_75 = arith.constant 0 : index
    %201 = vector.load %arg10[%200, %c0_75] : memref<64x128xf32, #tpu.memory_space<vmem>>, vector<8x128xf32>
    %cst_76 = arith.constant dense<0.000000e+00> : vector<8x128xf32>
    %202 = tpu.matmul %185, %11, %cst_76 {dimension_numbers = #tpu.dot_dimension_numbers<[1], [0], [0], [1], [0, 0, 1, 1], [], []>} : vector<8x128xf32>, vector<128x128xf32>, vector<8x128xf32> -> vector<8x128xf32>
    %203 = arith.addf %201, %202 : vector<8x128xf32>
    %204 = math.tanh %203 : vector<8x128xf32>
    %cst_77 = arith.constant 5.000000e-01 : f32
    %205 = vector.broadcast %cst_77 : f32 to vector<8x128xf32>
    %206 = arith.mulf %205, %203 : vector<8x128xf32>
    %207 = math.tanh %206 : vector<8x128xf32>
    %cst_78 = arith.constant 1.000000e+00 : f32
    %208 = vector.broadcast %cst_78 : f32 to vector<8x128xf32>
    %209 = arith.addf %208, %207 : vector<8x128xf32>
    %cst_79 = arith.constant 5.000000e-01 : f32
    %210 = vector.broadcast %cst_79 : f32 to vector<8x128xf32>
    %211 = arith.mulf %210, %209 : vector<8x128xf32>
    %212 = arith.select %18, %204, %211 : vector<8x128xi1>, vector<8x128xf32>
    %c64_i32_80 = arith.constant 64 : i32
    %213 = tpu.dynamic_rotate %212 by %c64_i32_80 dim 1 : vector<8x128xf32>, i32 -> vector<8x128xf32>
    %214 = arith.mulf %212, %213 : vector<8x128xf32>
    %c96_i32_81 = arith.constant 96 : i32
    %215 = tpu.dynamic_rotate %212 by %c96_i32_81 dim 1 : vector<8x128xf32>, i32 -> vector<8x128xf32>
    %c32_i32_82 = arith.constant 32 : i32
    %216 = tpu.dynamic_rotate %212 by %c32_i32_82 dim 1 : vector<8x128xf32>, i32 -> vector<8x128xf32>
    %217 = arith.mulf %215, %183 : vector<8x128xf32>
    %218 = arith.addf %217, %214 : vector<8x128xf32>
    %219 = math.tanh %218 : vector<8x128xf32>
    %220 = arith.mulf %216, %219 : vector<8x128xf32>
    %221 = arith.addi %19, %c5_i32 : i32
    %222 = vector.broadcast %221 : i32 to vector<8x1xi32>
    %223 = arith.cmpi sgt, %12, %222 : vector<8x1xi32>
    %224 = arith.extui %223 : vector<8x1xi1> to vector<8x1xi32>
    %225 = arith.sitofp %224 : vector<8x1xi32> to vector<8x1xf32>
    %cst_83 = arith.constant 1.000000e+00 : f32
    %226 = vector.broadcast %cst_83 : f32 to vector<8x1xf32>
    %227 = arith.subf %226, %225 : vector<8x1xf32>
    %cst_84 = arith.constant -1.000000e+30 : f32
    %228 = vector.broadcast %cst_84 : f32 to vector<8x1xf32>
    %229 = arith.mulf %227, %228 : vector<8x1xf32>
    %230 = vector.broadcast %229 : vector<8x1xf32> to vector<8x128xf32>
    %231 = arith.addf %220, %230 : vector<8x128xf32>
    %232 = arith.maximumf %197, %231 : vector<8x128xf32>
    %c6_i32 = arith.constant 6 : i32
    %c8_i32_85 = arith.constant 8 : i32
    %233 = arith.muli %c6_i32, %c8_i32_85 : i32
    %234 = tpu.assume_multiple %233, 8 : i32
    %235 = arith.index_cast %234 : i32 to index
    %c0_86 = arith.constant 0 : index
    %236 = vector.load %arg10[%235, %c0_86] : memref<64x128xf32, #tpu.memory_space<vmem>>, vector<8x128xf32>
    %cst_87 = arith.constant dense<0.000000e+00> : vector<8x128xf32>
    %237 = tpu.matmul %220, %11, %cst_87 {dimension_numbers = #tpu.dot_dimension_numbers<[1], [0], [0], [1], [0, 0, 1, 1], [], []>} : vector<8x128xf32>, vector<128x128xf32>, vector<8x128xf32> -> vector<8x128xf32>
    %238 = arith.addf %236, %237 : vector<8x128xf32>
    %239 = math.tanh %238 : vector<8x128xf32>
    %cst_88 = arith.constant 5.000000e-01 : f32
    %240 = vector.broadcast %cst_88 : f32 to vector<8x128xf32>
    %241 = arith.mulf %240, %238 : vector<8x128xf32>
    %242 = math.tanh %241 : vector<8x128xf32>
    %cst_89 = arith.constant 1.000000e+00 : f32
    %243 = vector.broadcast %cst_89 : f32 to vector<8x128xf32>
    %244 = arith.addf %243, %242 : vector<8x128xf32>
    %cst_90 = arith.constant 5.000000e-01 : f32
    %245 = vector.broadcast %cst_90 : f32 to vector<8x128xf32>
    %246 = arith.mulf %245, %244 : vector<8x128xf32>
    %247 = arith.select %18, %239, %246 : vector<8x128xi1>, vector<8x128xf32>
    %c64_i32_91 = arith.constant 64 : i32
    %248 = tpu.dynamic_rotate %247 by %c64_i32_91 dim 1 : vector<8x128xf32>, i32 -> vector<8x128xf32>
    %249 = arith.mulf %247, %248 : vector<8x128xf32>
    %c96_i32_92 = arith.constant 96 : i32
    %250 = tpu.dynamic_rotate %247 by %c96_i32_92 dim 1 : vector<8x128xf32>, i32 -> vector<8x128xf32>
    %c32_i32_93 = arith.constant 32 : i32
    %251 = tpu.dynamic_rotate %247 by %c32_i32_93 dim 1 : vector<8x128xf32>, i32 -> vector<8x128xf32>
    %252 = arith.mulf %250, %218 : vector<8x128xf32>
    %253 = arith.addf %252, %249 : vector<8x128xf32>
    %254 = math.tanh %253 : vector<8x128xf32>
    %255 = arith.mulf %251, %254 : vector<8x128xf32>
    %256 = arith.addi %19, %c6_i32 : i32
    %257 = vector.broadcast %256 : i32 to vector<8x1xi32>
    %258 = arith.cmpi sgt, %12, %257 : vector<8x1xi32>
    %259 = arith.extui %258 : vector<8x1xi1> to vector<8x1xi32>
    %260 = arith.sitofp %259 : vector<8x1xi32> to vector<8x1xf32>
    %cst_94 = arith.constant 1.000000e+00 : f32
    %261 = vector.broadcast %cst_94 : f32 to vector<8x1xf32>
    %262 = arith.subf %261, %260 : vector<8x1xf32>
    %cst_95 = arith.constant -1.000000e+30 : f32
    %263 = vector.broadcast %cst_95 : f32 to vector<8x1xf32>
    %264 = arith.mulf %262, %263 : vector<8x1xf32>
    %265 = vector.broadcast %264 : vector<8x1xf32> to vector<8x128xf32>
    %266 = arith.addf %255, %265 : vector<8x128xf32>
    %267 = arith.maximumf %232, %266 : vector<8x128xf32>
    %c7_i32 = arith.constant 7 : i32
    %c8_i32_96 = arith.constant 8 : i32
    %268 = arith.muli %c7_i32, %c8_i32_96 : i32
    %269 = tpu.assume_multiple %268, 8 : i32
    %270 = arith.index_cast %269 : i32 to index
    %c0_97 = arith.constant 0 : index
    %271 = vector.load %arg10[%270, %c0_97] : memref<64x128xf32, #tpu.memory_space<vmem>>, vector<8x128xf32>
    %cst_98 = arith.constant dense<0.000000e+00> : vector<8x128xf32>
    %272 = tpu.matmul %255, %11, %cst_98 {dimension_numbers = #tpu.dot_dimension_numbers<[1], [0], [0], [1], [0, 0, 1, 1], [], []>} : vector<8x128xf32>, vector<128x128xf32>, vector<8x128xf32> -> vector<8x128xf32>
    %273 = arith.addf %271, %272 : vector<8x128xf32>
    %274 = math.tanh %273 : vector<8x128xf32>
    %cst_99 = arith.constant 5.000000e-01 : f32
    %275 = vector.broadcast %cst_99 : f32 to vector<8x128xf32>
    %276 = arith.mulf %275, %273 : vector<8x128xf32>
    %277 = math.tanh %276 : vector<8x128xf32>
    %cst_100 = arith.constant 1.000000e+00 : f32
    %278 = vector.broadcast %cst_100 : f32 to vector<8x128xf32>
    %279 = arith.addf %278, %277 : vector<8x128xf32>
    %cst_101 = arith.constant 5.000000e-01 : f32
    %280 = vector.broadcast %cst_101 : f32 to vector<8x128xf32>
    %281 = arith.mulf %280, %279 : vector<8x128xf32>
    %282 = arith.select %18, %274, %281 : vector<8x128xi1>, vector<8x128xf32>
    %c64_i32_102 = arith.constant 64 : i32
    %283 = tpu.dynamic_rotate %282 by %c64_i32_102 dim 1 : vector<8x128xf32>, i32 -> vector<8x128xf32>
    %284 = arith.mulf %282, %283 : vector<8x128xf32>
    %c96_i32_103 = arith.constant 96 : i32
    %285 = tpu.dynamic_rotate %282 by %c96_i32_103 dim 1 : vector<8x128xf32>, i32 -> vector<8x128xf32>
    %c32_i32_104 = arith.constant 32 : i32
    %286 = tpu.dynamic_rotate %282 by %c32_i32_104 dim 1 : vector<8x128xf32>, i32 -> vector<8x128xf32>
    %287 = arith.mulf %285, %253 : vector<8x128xf32>
    %288 = arith.addf %287, %284 : vector<8x128xf32>
    %289 = math.tanh %288 : vector<8x128xf32>
    %290 = arith.mulf %286, %289 : vector<8x128xf32>
    %291 = arith.addi %19, %c7_i32 : i32
    %292 = vector.broadcast %291 : i32 to vector<8x1xi32>
    %293 = arith.cmpi sgt, %12, %292 : vector<8x1xi32>
    %294 = arith.extui %293 : vector<8x1xi1> to vector<8x1xi32>
    %295 = arith.sitofp %294 : vector<8x1xi32> to vector<8x1xf32>
    %cst_105 = arith.constant 1.000000e+00 : f32
    %296 = vector.broadcast %cst_105 : f32 to vector<8x1xf32>
    %297 = arith.subf %296, %295 : vector<8x1xf32>
    %cst_106 = arith.constant -1.000000e+30 : f32
    %298 = vector.broadcast %cst_106 : f32 to vector<8x1xf32>
    %299 = arith.mulf %297, %298 : vector<8x1xf32>
    %300 = vector.broadcast %299 : vector<8x1xf32> to vector<8x128xf32>
    %301 = arith.addf %290, %300 : vector<8x128xf32>
    %302 = arith.maximumf %267, %301 : vector<8x128xf32>
    %c8_i32_107 = arith.constant 8 : i32
    %c0_108 = arith.constant 0 : index
    %c0_109 = arith.constant 0 : index
    %303 = vector.load %arg11[%c0_108, %c0_109] : memref<8x128xf32, #tpu.memory_space<vmem>>, vector<8x128xf32>
    tpu.vector_store %arg11[%c0_108, %c0_109], %290 {strides = array<i32>} : memref<8x128xf32, #tpu.memory_space<vmem>>, vector<8x128xf32>,
    %c0_110 = arith.constant 0 : index
    %c0_111 = arith.constant 0 : index
    %304 = vector.load %arg12[%c0_110, %c0_111] : memref<8x128xf32, #tpu.memory_space<vmem>>, vector<8x128xf32>
    tpu.vector_store %arg12[%c0_110, %c0_111], %288 {strides = array<i32>} : memref<8x128xf32, #tpu.memory_space<vmem>>, vector<8x128xf32>,
    %c0_112 = arith.constant 0 : index
    %c0_113 = arith.constant 0 : index
    %305 = vector.load %arg13[%c0_112, %c0_113] : memref<8x128xf32, #tpu.memory_space<vmem>>, vector<8x128xf32>
    tpu.vector_store %arg13[%c0_112, %c0_113], %302 {strides = array<i32>} : memref<8x128xf32, #tpu.memory_space<vmem>>, vector<8x128xf32>,
    %c0_i32_114 = arith.constant 0 : i32
    %306 = arith.cmpi eq, %arg1, %c0_i32_114 : i32
    %307 = arith.extui %306 : i1 to i32
    %c0_i32_115 = arith.constant 0 : i32
    %308 = arith.cmpi ne, %307, %c0_i32_115 : i32
    scf.if %308 {
      %c0_116 = arith.constant 0 : index
      %c0_117 = arith.constant 0 : index
      %309 = vector.load %arg3[%c0_116, %c0_117] : memref<8x1xi32, #tpu.memory_space<vmem>>, vector<8x1xi32>
      %c0_i32_118 = arith.constant 0 : i32
      %310 = vector.broadcast %c0_i32_118 : i32 to vector<8x1xi32>
      %311 = arith.cmpi sgt, %309, %310 : vector<8x1xi32>
      %c0_119 = arith.constant 0 : index
      %c0_120 = arith.constant 0 : index
      %312 = vector.load %arg13[%c0_119, %c0_120] : memref<8x128xf32, #tpu.memory_space<vmem>>, vector<8x128xf32>
      %cst_121 = arith.constant 0.000000e+00 : f32
      %313 = vector.shape_cast %311 : vector<8x1xi1> to vector<8x1xi1>
      %314 = vector.broadcast %313 : vector<8x1xi1> to vector<8x128xi1>
      %315 = vector.broadcast %cst_121 : f32 to vector<8x128xf32>
      %316 = arith.select %314, %312, %315 : vector<8x128xi1>, vector<8x128xf32>
      %c0_122 = arith.constant 0 : index
      %c0_123 = arith.constant 0 : index
      %317 = vector.load %arg7[%c0_122, %c0_123] : memref<128x128xf32, #tpu.memory_space<vmem>>, vector<128x128xf32>
      %cst_124 = arith.constant dense<0.000000e+00> : vector<8x128xf32>
      %318 = tpu.matmul %316, %317, %cst_124 {dimension_numbers = #tpu.dot_dimension_numbers<[1], [0], [0], [1], [0, 0, 1, 1], [], []>} : vector<8x128xf32>, vector<128x128xf32>, vector<8x128xf32> -> vector<8x128xf32>
      %c0_125 = arith.constant 0 : index
      %c0_126 = arith.constant 0 : index
      %319 = vector.load %arg8[%c0_125, %c0_126] : memref<1x128xf32, #tpu.memory_space<vmem>>, vector<1x128xf32>
      %320 = vector.broadcast %319 : vector<1x128xf32> to vector<8x128xf32>
      %321 = arith.addf %318, %320 : vector<8x128xf32>
      %c0_127 = arith.constant 0 : index
      %c0_128 = arith.constant 0 : index
      %322 = vector.load %arg9[%c0_127, %c0_128] : memref<8x128xf32, #tpu.memory_space<vmem>>, vector<8x128xf32>
      tpu.vector_store %arg9[%c0_127, %c0_128], %321 {strides = array<i32>} : memref<8x128xf32, #tpu.memory_space<vmem>>, vector<8x128xf32>,
    } else {
    }
    return
  }
  func.func @transform_0(%arg0: i32, %arg1: i32) -> (i32, i32, i32) {
    %c0_i32 = arith.constant 0 : i32
    %c0_i32_0 = arith.constant 0 : i32
    return %arg1, %arg0, %c0_i32 : i32, i32, i32
  }
  func.func @transform_1(%arg0: i32, %arg1: i32) -> (i32, i32) {
    %c0_i32 = arith.constant 0 : i32
    %c0_i32_0 = arith.constant 0 : i32
    return %arg0, %c0_i32 : i32, i32
  }
  func.func @transform_2(%arg0: i32, %arg1: i32) -> (i32, i32) {
    %c0_i32 = arith.constant 0 : i32
    %c0_i32_0 = arith.constant 0 : i32
    %c0_i32_1 = arith.constant 0 : i32
    return %c0_i32, %c0_i32_0 : i32, i32
  }
  func.func @transform_3(%arg0: i32, %arg1: i32) -> (i32, i32) {
    %c0_i32 = arith.constant 0 : i32
    %c0_i32_0 = arith.constant 0 : i32
    %c0_i32_1 = arith.constant 0 : i32
    return %c0_i32, %c0_i32_0 : i32, i32
  }
  func.func @transform_4(%arg0: i32, %arg1: i32) -> (i32, i32) {
    %c0_i32 = arith.constant 0 : i32
    %c0_i32_0 = arith.constant 0 : i32
    %c0_i32_1 = arith.constant 0 : i32
    return %c0_i32, %c0_i32_0 : i32, i32
  }
  func.func @transform_5(%arg0: i32, %arg1: i32) -> (i32, i32) {
    %c0_i32 = arith.constant 0 : i32
    %c0_i32_0 = arith.constant 0 : i32
    %c0_i32_1 = arith.constant 0 : i32
    return %c0_i32, %c0_i32_0 : i32, i32
  }
  func.func @transform_6(%arg0: i32, %arg1: i32) -> (i32, i32) {
    %c0_i32 = arith.constant 0 : i32
    %c0_i32_0 = arith.constant 0 : i32
    %c0_i32_1 = arith.constant 0 : i32
    return %c0_i32, %c0_i32_0 : i32, i32
  }
  func.func @transform_7(%arg0: i32, %arg1: i32) -> (i32, i32) {
    %c0_i32 = arith.constant 0 : i32
    %c0_i32_0 = arith.constant 0 : i32
    return %arg0, %c0_i32 : i32, i32
  }
}

</mosaic_0001>

<bundles_post_ra>
// kernel: tpu_custom_call.1
= control target key start
LH: loop header
LB: loop body
LE: loop exit
PB: predicated region body
PF: predicated region fallthrough
CT: control target
= control target key end

     0   :  { %12 = vsyncpa [#allocation7], 0  ;;  %s2541_s0 = inlined_call_operand.hbm [shape: f32[8,8,16], index: 0, kind: input, shape index: {}]   ;;  %s2542_s1 = inlined_call_operand.vmem [shape: s32[8,1], index: 1, kind: input, shape index: {}]   ;;  %s2543_s2 = inlined_call_operand.vmem [shape: f32[16,128], index: 2, kind: input, shape index: {}]   ;;  %s2544_s3 = inlined_call_operand.vmem [shape: f32[1,128], index: 3, kind: input, shape index: {}]   ;;  %s2545_s4 = inlined_call_operand.hbm [shape: f32[128,128], index: 4, kind: input, shape index: {}]   ;;  %s2546_s5 = inlined_call_operand.hbm [shape: f32[128,128], index: 5, kind: input, shape index: {}]   ;;  %s2547_s6 = inlined_call_operand.vmem [shape: f32[1,128], index: 6, kind: input, shape index: {}]   ;;  %s2548_s7 = inlined_call_operand.hbm [shape: f32[8,128], index: 7, kind: output, shape index: {}]  }
   0x1   :  { %13 = vsyncpa [#allocation10], 0 }
   0x2   :  { %14 = vsyncpa [#allocation8], 0  ;;  %s2101_s24 = smov [#allocation9]   ;;  %s2102_s26 = smov [#allocation6]  }
   0x3   :  { %s38_s25 = sshll.u32 %s2101_s24, 4  ;;  %s20_s27 = sshll.u32 %s2102_s26, 4  ;;  %s39_s25 = int_to_ptr.vmem [resolvable:$true] %s38_s25  ;;  %s2154_s27 = int_to_ptr.vmem [resolvable:$true] %s20_s27 }
   0x4   :  { %s2007_s30 = scalar_lea.hbm %s2545_s4, 2048 }
   0x5   :  { %p2008_p0 = scmp.ne.s32.totalorder %s2545_s4, %s2007_s30  ;;  %p2011_p1 = scmp.lt.u32.totalorder %s2007_s30, %s2545_s4 }
   0x7   :  { %p2013_p2 = pnand %p2011_p1, %p2008_p0 }
   0x9   :  { %2016 = shalt.err (!%p2013_p2)
}
   0xa   :  { %s2017_s12 = scalar_lea.vmem %s39_s25, 2048  ;;  %p2022_p4 = scmp.lt.s32.totalorder %s39_s25, %s39_s25 }
   0xb   :  { %p2018_p3 = scmp.ne.s32.totalorder %s39_s25, %s2017_s12  ;;  %p2023_p5 = scmp.lt.s32.totalorder %s2017_s12, %s2017_s12 }
   0xd   :  { %p2024_p6 = por %p2023_p5, %p2022_p4 }
   0xf   :  { %p2025_p7 = pnand %p2024_p6, %p2018_p3 }
  0x11   :  { %2028 = shalt.err (!%p2025_p7)
}
  0x12   :  { %s2103_s13 = smov 128   ;;  %s2104_s14 = smov 8  }
  0x13   :  { %44 = dma.hbm_to_vmem [thread:$0]  %s2545_s4, 2048, %s39_s25, [#allocation10], %s2103_s13, %s2103_s13, %s2104_s14  }
  0x14   :  { %s2029_s19 = scalar_lea.hbm %s2541_s0, 1024 }
  0x15   :  { %p2030_p8 = scmp.ne.s32.totalorder %s2541_s0, %s2029_s19  ;;  %p2033_p9 = scmp.lt.u32.totalorder %s2029_s19, %s2541_s0 }
  0x17   :  { %p2035_p10 = pnand %p2033_p9, %p2030_p8 }
  0x19   :  { %2038 = shalt.err (!%p2035_p10)
}
  0x1a   :  { %s2039_s24 = scalar_lea.vmem %s2154_s27, 1024  ;;  %p2044_p12 = scmp.lt.s32.totalorder %s2154_s27, %s2154_s27 }
  0x1b   :  { %p2040_p11 = scmp.ne.s32.totalorder %s2154_s27, %s2039_s24  ;;  %p2045_p13 = scmp.lt.s32.totalorder %s2039_s24, %s2039_s24 }
  0x1d   :  { %p2046_p0 = por %p2045_p13, %p2044_p12 }
  0x1f   :  { %p2047_p1 = pnand %p2046_p0, %p2040_p11 }
  0x21   :  { %2050 = shalt.err (!%p2047_p1)
}
  0x22   :  { %26 = dma.hbm_to_vmem [thread:$0]  %s2541_s0, 1024, %s2154_s27, [#allocation7], %s2103_s13, %s2103_s13, %s2104_s14  }
  0x23   :  { %s2105_s26 = smov [#allocation11]   ;;  %s2051_s8 = scalar_lea.hbm %s2546_s5, 2048 }
  0x24   :  { %s50_s28 = sshll.u32 %s2105_s26, 4  ;;  %p2052_p2 = scmp.ne.s32.totalorder %s2546_s5, %s2051_s8  ;;  %s51_s28 = int_to_ptr.vmem [resolvable:$true] %s50_s28 }
  0x25   :  { %p2055_p3 = scmp.lt.u32.totalorder %s2051_s8, %s2546_s5 }
  0x27   :  { %p2057_p4 = pnand %p2055_p3, %p2052_p2 }
  0x29   :  { %2060 = shalt.err (!%p2057_p4)
}
  0x2a   :  { %s2061_s15 = scalar_lea.vmem %s51_s28, 2048  ;;  %p2066_p6 = scmp.lt.s32.totalorder %s51_s28, %s51_s28 }
  0x2b   :  { %p2062_p5 = scmp.ne.s32.totalorder %s51_s28, %s2061_s15  ;;  %p2067_p7 = scmp.lt.s32.totalorder %s2061_s15, %s2061_s15 }
  0x2d   :  { %p2068_p8 = por %p2067_p7, %p2066_p6 }
  0x2f   :  { %p2069_p9 = pnand %p2068_p8, %p2062_p5 }
  0x31   :  { %2072 = shalt.err (!%p2069_p9)
}
  0x32   :  { %56 = dma.hbm_to_vmem [thread:$0]  %s2546_s5, 2048, %s51_s28, [#allocation10], %s2103_s13, %s2103_s13, %s2104_s14  }
  0x33   :  { %2095 = dma.done.wait [#allocation7], 1024  }
  0x34   :  { %2096 = vsyncadd [#allocation7], 4294966272 }
  0x35   :  { %2097 = dma.done.wait [#allocation10], 4096  }
  0x36   :  { %2098 = vsyncadd [#allocation10], 4294963200  ;;  %v2106_v0 = vmov 0.0|0.0   ;;  %vm2107_vm0 = vmmov 0   ;;  %v2108_v1 = vmov 0.0   ;;  %v230_v2 = vld [vmem:[#allocation9] sm:$0xff]  ;;  %v247_v39 = vlaneseq }
  0x37   :  { %1728 = vmatprep.subr.bf16.mxu1 %v2106_v0  ;;  %1441 = vmatprep.mubr.msk.f32.mxu1 %vm2107_vm0, %v2108_v1  ;;  %v231_v3 = vld [vmem:[#allocation9 + $0x8] sm:$0xff]  ;;  %v232_v4 = vld [vmem:[#allocation9 + $0x10] sm:$0xff]  ;;  %v233_v6 = vld [vmem:[#allocation9 + $0x18] sm:$0xff]  ;;  %vm92_vm1 = vcmask 130048   ;;  %s2110_s18 = smov 64   ;;  %s2111_s19 = smov 96  }
  0x38   :  { %v2209_v5 = vpack.c.bf16 %v231_v3, %v230_v2  ;;  %v2212_v7 = vpack.c.bf16 %v233_v6, %v232_v4  ;;  %v234_v8 = vld [vmem:[#allocation9 + $0x20] sm:$0xff]  ;;  %v235_v9 = vld [vmem:[#allocation9 + $0x28] sm:$0xff]  ;;  %v236_v15 = vld [vmem:[#allocation9 + $0x30] sm:$0xff]  ;;  %v248_v40 = vand.u32 127, %v247_v39  ;;  %s2113_s23 = smov [#allocation12]  }
  0x39   :  { %v83_v10 = vld [vmem:[%s2543_s2] sm:$0xff]  ;;  %v84_v11 = vld [vmem:[%s2543_s2 + $0x8] sm:$0xff]  ;;  %v2223_v14 = vpack.c.bf16 %v235_v9, %v234_v8  ;;  %v237_v16 = vld [vmem:[#allocation9 + $0x38] sm:$0xff]  ;;  %s1201_s24 = sshll.u32 %s2113_s23, 4  ;;  %s1202_s24 = int_to_ptr.vmem [resolvable:$true] %s1201_s24 }
  0x3a   :  { %1730 = vmatpush3.bf16.msra.mxu1 %v2209_v5  ;;  %v1724_v12 = vpack.c.bf16 %v84_v11, %v83_v10  ;;  %v75_v13 = vld [vmem:[#allocation6] sm:$0xff]  ;;  %v76_v17 = vld [vmem:[#allocation6 + $0x8] sm:$0xff]  ;;  %v2228_v18 = vpack.c.bf16 %v237_v16, %v236_v15  ;;  %v240_v22 = vld [vmem:[#allocation9 + $0x50] sm:$0xff]  ;;  %vm249_vm2 = vcmp.ge.s32.totalorder %v248_v40, 64  ;;  %vm250_vm3 = vcmp.lt.s32.totalorder %v248_v40, 96  ;;  %s2073_s4 = scalar_lea.vmem %s1202_s24, 128  ;;  %p2078_p11 = scmp.lt.s32.totalorder %s1202_s24, %s1202_s24 }
  0x3b   :  { %1731 = vmatprep.subr.bf16.mxu1 %v2106_v0  ;;  %1397 = vmatprep.mubr.msk.f32.mxu0 %vm92_vm1, %v75_v13  ;;  %v238_v19 = vld [vmem:[#allocation9 + $0x40] sm:$0xff]  ;;  %v239_v20 = vld [vmem:[#allocation9 + $0x48] sm:$0xff]  ;;  %v241_v23 = vld [vmem:[#allocation9 + $0x58] sm:$0xff]  ;;  %p2074_p10 = scmp.ne.s32.totalorder %s1202_s24, %s2073_s4  ;;  %p2079_p12 = scmp.lt.s32.totalorder %s2073_s4, %s2073_s4 }
  0x3c   :  { %1725 = vmatprep.subr.bf16.mxu0 %v1724_v12  ;;  %v2235_v21 = vpack.c.bf16 %v239_v20, %v238_v19  ;;  %v2241_v24 = vpack.c.bf16 %v241_v23, %v240_v22  ;;  %v242_v25 = vld [vmem:[#allocation9 + $0x60] sm:$0xff]  ;;  %v243_v26 = vld [vmem:[#allocation9 + $0x68] sm:$0xff]  ;;  %v244_v28 = vld [vmem:[#allocation9 + $0x70] sm:$0xff] }
  0x3d   :  { %1727 = vmatpush3.bf16.msra.mxu0 %v1724_v12  ;;  %v2247_v27 = vpack.c.bf16 %v243_v26, %v242_v25  ;;  %v245_v29 = vld [vmem:[#allocation9 + $0x78] sm:$0xff]  ;;  %v2290_v33 = vld [vmem:[%s2544_s3] ss:$0 sm:$0xff]  ;;  %v77_v41 = vld [vmem:[#allocation6 + $0x10] sm:$0xff]  ;;  %s2109_s3 = smov 32   ;;  %p2080_p13 = por %p2079_p12, %p2078_p11 }
  0x3e   :  { %1733 = vmatpush3.bf16.msra.mxu1 %v2212_v7  ;;  %1752 = vmatprep.subr.bf16.mxu0 %v2106_v0  ;;  %v2253_v30 = vpack.c.bf16 %v245_v29, %v244_v28  ;;  %v78_v43 = vld [vmem:[#allocation6 + $0x18] sm:$0xff]  ;;  %v79_v45 = vld [vmem:[#allocation6 + $0x20] sm:$0xff]  ;;  %vm2295_vm4 = vmand %vm249_vm2, %vm250_vm3 }
  0x3f   :  { %1734 = vmatprep.subr.bf16.mxu1 %v2106_v0  ;;  %v80_v47 = vld [vmem:[#allocation6 + $0x28] sm:$0xff]  ;;  %v81_v50 = vld [vmem:[#allocation6 + $0x30] sm:$0xff]  ;;  %v82_v52 = vld [vmem:[#allocation6 + $0x38] sm:$0xff]  ;;  %p2081_p0 = pnand %p2080_p13, %p2074_p10 }
  0x40   :  { %1398 = vmatmul.mubr.msk.f32.vlgmr.msra.gmra.mrb[0].mxu0 %vm92_vm1, %v76_v17 }
  0x41   :  { %1754 = vmatpush3.bf16.msra.mxu0 %v2209_v5  ;;  %1400 = vmatprep.mubr.msk.f32.mxu0 %vm92_vm1, %v77_v41 }
  0x42   :  { %1736 = vmatpush3.bf16.msra.mxu1 %v2223_v14  ;;  %1755 = vmatprep.subr.bf16.mxu0 %v2106_v0 }
  0x43   :  { %1737 = vmatprep.subr.bf16.mxu1 %v2106_v0 }
  0x44   :  { %1401 = vmatmul.mubr.msk.f32.gmra.mrb[2].mxu0 %vm92_vm1, %v78_v43 }
  0x45   :  { %1757 = vmatpush3.bf16.msra.mxu0 %v2212_v7  ;;  %1403 = vmatprep.mubr.msk.f32.mxu0 %vm92_vm1, %v79_v45 }
  0x46   :  { %1739 = vmatpush3.bf16.msra.mxu1 %v2228_v18  ;;  %1758 = vmatprep.subr.bf16.mxu0 %v2106_v0 }
  0x47   :  { %1740 = vmatprep.subr.bf16.mxu1 %v2106_v0 }
  0x48   :  { %1404 = vmatmul.mubr.msk.f32.gmra.mrb[4].mxu0 %vm92_vm1, %v80_v47 }
  0x49   :  { %1760 = vmatpush3.bf16.msra.mxu0 %v2223_v14  ;;  %1406 = vmatprep.mubr.msk.f32.mxu0 %vm92_vm1, %v81_v50 }
  0x4a   :  { %1742 = vmatpush3.bf16.msra.mxu1 %v2235_v21  ;;  %1761 = vmatprep.subr.bf16.mxu0 %v2106_v0 }
  0x4b   :  { %1743 = vmatprep.subr.bf16.mxu1 %v2106_v0 }
  0x4c   :  { %1407 = vmatmul.mubr.msk.f32.gmra.mrb[6].mxu0 %vm92_vm1, %v82_v52 }
  0x4d   :  { %1763 = vmatpush3.bf16.msra.mxu0 %v2228_v18  ;;  %1476 = vmatprep.mubr.msk.f32.mxu0 %vm2107_vm0, %v2108_v1 }
  0x4e   :  { %1745 = vmatpush3.bf16.msra.mxu1 %v2241_v24  ;;  %1764 = vmatprep.subr.bf16.mxu0 %v2106_v0 }
  0x4f   :  { %1746 = vmatprep.subr.bf16.mxu1 %v2106_v0 }
  0x51   :  { %1766 = vmatpush3.bf16.msra.mxu0 %v2235_v21 }
  0x52   :  { %1748 = vmatpush3.bf16.msra.mxu1 %v2247_v27  ;;  %1767 = vmatprep.subr.bf16.mxu0 %v2106_v0 }
  0x53   :  { %1749 = vmatprep.subr.bf16.mxu1 %v2106_v0 }
  0x55   :  { %1769 = vmatpush3.bf16.msra.mxu0 %v2241_v24 }
  0x56   :  { %1751 = vmatpush3.bf16.msra.mxu1 %v2253_v30  ;;  %1770 = vmatprep.subr.bf16.mxu0 %v2106_v0 }
  0x57   :  { %1776 = vmatprep.subr.bf16.mxu1 %v2106_v0 }
  0x59   :  { %1442 = vmatmul.mubr.f32.vlgmr.msra.gmra.mrb[0].mxu1 %v2108_v1  ;;  %1772 = vmatpush3.bf16.msra.mxu0 %v2247_v27 }
  0x5a   :  { %1778 = vmatpush3.bf16.msra.mxu1 %v2209_v5  ;;  %1511 = vmatprep.mubr.msk.f32.mxu1 %vm2107_vm0, %v2108_v1 }
  0x5b   :  { %1779 = vmatprep.subr.bf16.mxu1 %v2106_v0  ;;  %1773 = vmatprep.subr.bf16.mxu0 %v2106_v0 }
  0x5d   :  { %1775 = vmatpush3.bf16.msra.mxu0 %v2253_v30 }
  0x5e   :  { %1781 = vmatpush3.bf16.msra.mxu1 %v2212_v7  ;;  %1800 = vmatprep.subr.bf16.mxu0 %v2106_v0 }
  0x5f   :  { %1782 = vmatprep.subr.bf16.mxu1 %v2106_v0 }
  0x62   :  { %1784 = vmatpush3.bf16.msra.mxu1 %v2223_v14 }
  0x63   :  { %1785 = vmatprep.subr.bf16.mxu1 %v2106_v0 }
  0x66   :  { %1787 = vmatpush3.bf16.msra.mxu1 %v2228_v18 }
  0x67   :  { %1788 = vmatprep.subr.bf16.mxu1 %v2106_v0 }
  0x6a   :  { %1790 = vmatpush3.bf16.msra.mxu1 %v2235_v21 }
  0x6b   :  { %1791 = vmatprep.subr.bf16.mxu1 %v2106_v0 }
  0x6e   :  { %1793 = vmatpush3.bf16.msra.mxu1 %v2241_v24 }
  0x6f   :  { %1794 = vmatprep.subr.bf16.mxu1 %v2106_v0 }
  0x72   :  { %1796 = vmatpush3.bf16.msra.mxu1 %v2247_v27 }
  0x73   :  { %1797 = vmatprep.subr.bf16.mxu1 %v2106_v0 }
  0x76   :  { %1799 = vmatpush3.bf16.msra.mxu1 %v2253_v30 }
  0x77   :  { %1824 = vmatprep.subr.bf16.mxu1 %v2106_v0 }
 0x113   :  { %v2285_v31 = vpop.f32.mrb[0].mxu0 }
 0x114   :  { %v183_v32 = vpop.f32.mrb[1].mxu0  ;;  %v189_v6 = vadd.f32 %v2285_v31, %v2290_v33 }
 0x115   :  { %v184_v34 = vadd.f32 %v2290_v33, %v183_v32 }
 0x117   :  { %v2331_v61 = vpop.f32.mrb[2].mxu0 }
 0x118   :  { %v193_v62 = vpop.f32.mrb[3].mxu0 }
 0x119   :  { %v194_v31 = vadd.f32 %v2290_v33, %v193_v62 }
 0x11b   :  { %v2333_v63 = vpop.f32.mrb[4].mxu0 }
 0x11c   :  { %v2335_v2 = vpop.f32.mrb[5].mxu0 }
 0x11f   :  { %v2337_v3 = vpop.f32.mrb[6].mxu0 }
 0x120   :  { %v2339_v4 = vpop.f32.mrb[7].mxu0 }
 0x12c   :  { %v323_v35 = vpop.f32.mrb[0].mxu1 }
 0x12d   :  { %v327_v36 = vadd.f32 %v323_v35, %v184_v34  ;;  %v1443_v37 = vpop.f32.mrb[1].mxu1 }
 0x12f   :  { %v329_v38 = vmul.f32 0.5, %v327_v36 }
 0x131   :  { %1959 = vtanh.f32 %v329_v38 }
 0x132   :  { %1961 = vtanh.f32 %v327_v36 }
 0x13b   :  { %v1960_v42 = vpop.eup %1959 }
 0x13c   :  { %v331_v44 = vadd.f32 1.0, %v1960_v42  ;;  %v1962_v49 = vpop.eup %1961 }
 0x13e   :  { %v332_v48 = vmul.f32 0.5, %v331_v44 }
 0x140   :  { %v333_v51 = vsel %vm2295_vm4, %v1962_v49, %v332_v48 }
 0x141   :  { %339 = vrot.lane.b32.xlu1 %v333_v51, %s2109_s3  ;;  %334 = vrot.lane.b32.xlu0 %v333_v51, %s2110_s18 }
 0x145   :  { %337 = vrot.lane.b32.xlu0 %v333_v51, %s2111_s19 }
 0x1b3   :  { %v335_v53 = vpop.permute.xlu0 %334  ;;  %v340_v59 = vpop.permute.xlu1 %339 }
 0x1b4   :  { %v336_v55 = vmul.f32 %v335_v53, %v333_v51  ;;  %v199_v51 = vadd.f32 %v2331_v61, %v2290_v33 }
 0x1b7   :  { %v338_v54 = vpop.permute.xlu0 %337 }
 0x1b8   :  { %v341_v56 = vmul.f32 0.0, %v338_v54 }
 0x1ba   :  { %v342_v57 = vadd.f32 %v341_v56, %v336_v55 }
 0x1bc   :  { %1963 = vtanh.f32 %v342_v57 }
 0x1c6   :  { %v1964_v58 = vpop.eup %1963 }
 0x1c7   :  { %v2310_v60 = vmul.f32 %v1964_v58, %v340_v59 }
 0x1c9   :  { %1477 = vmatmul.mubr.f32.vlgmr.msra.gmra.mrb[8].mxu0 %v2310_v60 }
 0x1ca   :  { %1802 = vmatpush3.bf16.msra.mxu0 %v2209_v5  ;;  %1546 = vmatprep.mubr.msk.f32.mxu0 %vm2107_vm0, %v2108_v1 }
 0x1cb   :  { %1803 = vmatprep.subr.bf16.mxu0 %v2106_v0 }
 0x1ce   :  { %1805 = vmatpush3.bf16.msra.mxu0 %v2212_v7 }
 0x1cf   :  { %1806 = vmatprep.subr.bf16.mxu0 %v2106_v0 }
 0x1d2   :  { %1808 = vmatpush3.bf16.msra.mxu0 %v2223_v14 }
 0x1d3   :  { %1809 = vmatprep.subr.bf16.mxu0 %v2106_v0 }
 0x1d6   :  { %1811 = vmatpush3.bf16.msra.mxu0 %v2228_v18 }
 0x1d7   :  { %1812 = vmatprep.subr.bf16.mxu0 %v2106_v0 }
 0x1da   :  { %1814 = vmatpush3.bf16.msra.mxu0 %v2235_v21 }
 0x1db   :  { %1815 = vmatprep.subr.bf16.mxu0 %v2106_v0 }
 0x1de   :  { %1817 = vmatpush3.bf16.msra.mxu0 %v2241_v24 }
 0x1df   :  { %1818 = vmatprep.subr.bf16.mxu0 %v2106_v0 }
 0x1e2   :  { %1820 = vmatpush3.bf16.msra.mxu0 %v2247_v27 }
 0x1e3   :  { %1821 = vmatprep.subr.bf16.mxu0 %v2106_v0 }
 0x1e6   :  { %1823 = vmatpush3.bf16.msra.mxu0 %v2253_v30 }
 0x1e7   :  { %1848 = vmatprep.subr.bf16.mxu0 %v2106_v0 }
 0x29c   :  { %v426_v8 = vpop.f32.mrb[8].mxu0 }
 0x29d   :  { %v430_v9 = vadd.f32 %v426_v8, %v189_v6  ;;  %v1478_v10 = vpop.f32.mrb[9].mxu0 }
 0x29f   :  { %v432_v11 = vmul.f32 0.5, %v430_v9 }
 0x2a1   :  { %1965 = vtanh.f32 %v432_v11 }
 0x2a2   :  { %1967 = vtanh.f32 %v430_v9 }
 0x2ab   :  { %v1966_v12 = vpop.eup %1965 }
 0x2ac   :  { %v434_v13 = vadd.f32 1.0, %v1966_v12  ;;  %v1968_v16 = vpop.eup %1967 }
 0x2ae   :  { %v435_v15 = vmul.f32 0.5, %v434_v13 }
 0x2b0   :  { %v436_v17 = vsel %vm2295_vm4, %v1968_v16, %v435_v15  ;;  %v204_v15 = vadd.f32 %v2290_v33, %v2335_v2 }
 0x2b1   :  { %440 = vrot.lane.b32.xlu0 %v436_v17, %s2111_s19  ;;  %437 = vrot.lane.b32.xlu1 %v436_v17, %s2110_s18 }
 0x2b5   :  { %442 = vrot.lane.b32.xlu1 %v436_v17, %s2109_s3 }
 0x323   :  { %v441_v19 = vpop.permute.xlu0 %440  ;;  %v438_v20 = vpop.permute.xlu1 %437 }
 0x324   :  { %v444_v22 = vmul.f32 %v441_v19, %v342_v57  ;;  %v439_v23 = vmul.f32 %v438_v20, %v436_v17 }
 0x326   :  { %v445_v25 = vadd.f32 %v444_v22, %v439_v23 }
 0x327   :  { %v443_v28 = vpop.permute.xlu1 %442 }
 0x328   :  { %1969 = vtanh.f32 %v445_v25 }
 0x332   :  { %v1970_v26 = vpop.eup %1969 }
 0x333   :  { %v2348_v29 = vmul.f32 %v1970_v26, %v443_v28 }
 0x335   :  { %1512 = vmatmul.mubr.f32.vlgmr.msra.gmra.mrb[2].mxu1 %v2348_v29 }
 0x336   :  { %1826 = vmatpush3.bf16.msra.mxu1 %v2209_v5  ;;  %1581 = vmatprep.mubr.msk.f32.mxu1 %vm2107_vm0, %v2108_v1 }
 0x337   :  { %1827 = vmatprep.subr.bf16.mxu1 %v2106_v0 }
 0x33a   :  { %1829 = vmatpush3.bf16.msra.mxu1 %v2212_v7 }
 0x33b   :  { %1830 = vmatprep.subr.bf16.mxu1 %v2106_v0 }
 0x33e   :  { %1832 = vmatpush3.bf16.msra.mxu1 %v2223_v14 }
 0x33f   :  { %1833 = vmatprep.subr.bf16.mxu1 %v2106_v0 }
 0x342   :  { %1835 = vmatpush3.bf16.msra.mxu1 %v2228_v18 }
 0x343   :  { %1836 = vmatprep.subr.bf16.mxu1 %v2106_v0 }
 0x346   :  { %1838 = vmatpush3.bf16.msra.mxu1 %v2235_v21 }
 0x347   :  { %1839 = vmatprep.subr.bf16.mxu1 %v2106_v0 }
 0x34a   :  { %1841 = vmatpush3.bf16.msra.mxu1 %v2241_v24 }
 0x34b   :  { %1842 = vmatprep.subr.bf16.mxu1 %v2106_v0 }
 0x34e   :  { %1844 = vmatpush3.bf16.msra.mxu1 %v2247_v27 }
 0x34f   :  { %1845 = vmatprep.subr.bf16.mxu1 %v2106_v0 }
 0x352   :  { %1847 = vmatpush3.bf16.msra.mxu1 %v2253_v30 }
 0x353   :  { %1872 = vmatprep.subr.bf16.mxu1 %v2106_v0 }
 0x408   :  { %v530_v32 = vpop.f32.mrb[2].mxu1 }
 0x409   :  { %v534_v34 = vadd.f32 %v530_v32, %v194_v31  ;;  %v1513_v35 = vpop.f32.mrb[3].mxu1 }
 0x40b   :  { %v536_v36 = vmul.f32 0.5, %v534_v34 }
 0x40d   :  { %1971 = vtanh.f32 %v536_v36 }
 0x40e   :  { %1973 = vtanh.f32 %v534_v34 }
 0x417   :  { %v1972_v37 = vpop.eup %1971 }
 0x418   :  { %v538_v38 = vadd.f32 1.0, %v1972_v37  ;;  %v1974_v40 = vpop.eup %1973 }
 0x41a   :  { %v539_v39 = vmul.f32 0.5, %v538_v38 }
 0x41c   :  { %v540_v41 = vsel %vm2295_vm4, %v1974_v40, %v539_v39 }
 0x41d   :  { %544 = vrot.lane.b32.xlu1 %v540_v41, %s2111_s19  ;;  %541 = vrot.lane.b32.xlu0 %v540_v41, %s2110_s18 }
 0x421   :  { %546 = vrot.lane.b32.xlu0 %v540_v41, %s2109_s3 }
 0x48f   :  { %v545_v42 = vpop.permute.xlu1 %544  ;;  %v542_v43 = vpop.permute.xlu0 %541 }
 0x490   :  { %v548_v44 = vmul.f32 %v545_v42, %v445_v25  ;;  %v543_v45 = vmul.f32 %v542_v43, %v540_v41 }
 0x492   :  { %v549_v47 = vadd.f32 %v548_v44, %v543_v45 }
 0x493   :  { %v547_v49 = vpop.permute.xlu0 %546 }
 0x494   :  { %1975 = vtanh.f32 %v549_v47 }
 0x49e   :  { %v1976_v48 = vpop.eup %1975 }
 0x49f   :  { %v2375_v50 = vmul.f32 %v1976_v48, %v547_v49  ;;  %v2112_v49 = vmov 0  }
 0x4a0   :  { %1957 = vset.pattern.permute.xlu1 %v2112_v49  ;;  %1958 = vset.pattern.permute.xlu0 %v2112_v49 }
 0x4a1   :  { %1547 = vmatmul.mubr.f32.vlgmr.msra.gmra.mrb[10].mxu0 %v2375_v50 }
 0x4a2   :  { %1850 = vmatpush3.bf16.msra.mxu0 %v2209_v5  ;;  %1616 = vmatprep.mubr.msk.f32.mxu0 %vm2107_vm0, %v2108_v1 }
 0x4a3   :  { %1851 = vmatprep.subr.bf16.mxu0 %v2106_v0 }
 0x4a6   :  { %1853 = vmatpush3.bf16.msra.mxu0 %v2212_v7 }
 0x4a7   :  { %1854 = vmatprep.subr.bf16.mxu0 %v2106_v0 }
 0x4aa   :  { %1856 = vmatpush3.bf16.msra.mxu0 %v2223_v14 }
 0x4ab   :  { %1857 = vmatprep.subr.bf16.mxu0 %v2106_v0 }
 0x4ae   :  { %1859 = vmatpush3.bf16.msra.mxu0 %v2228_v18 }
 0x4af   :  { %1860 = vmatprep.subr.bf16.mxu0 %v2106_v0 }
 0x4b2   :  { %1862 = vmatpush3.bf16.msra.mxu0 %v2235_v21 }
 0x4b3   :  { %1863 = vmatprep.subr.bf16.mxu0 %v2106_v0 }
 0x4b6   :  { %1865 = vmatpush3.bf16.msra.mxu0 %v2241_v24 }
 0x4b7   :  { %1866 = vmatprep.subr.bf16.mxu0 %v2106_v0 }
 0x4ba   :  { %1868 = vmatpush3.bf16.msra.mxu0 %v2247_v27 }
 0x4bb   :  { %1869 = vmatprep.subr.bf16.mxu0 %v2106_v0 }
 0x4be   :  { %1871 = vmatpush3.bf16.msra.mxu0 %v2253_v30 }
 0x4bf   :  { %1896 = vmatprep.subr.bf16.mxu0 %v2106_v0 }
 0x574   :  { %v634_v52 = vpop.f32.mrb[10].mxu0 }
 0x575   :  { %v638_v53 = vadd.f32 %v634_v52, %v199_v51  ;;  %v1548_v54 = vpop.f32.mrb[11].mxu0  ;;  %v214_v51 = vadd.f32 %v2290_v33, %v2339_v4 }
 0x577   :  { %v640_v55 = vmul.f32 0.5, %v638_v53 }
 0x579   :  { %1977 = vtanh.f32 %v640_v55 }
 0x57a   :  { %1979 = vtanh.f32 %v638_v53 }
 0x583   :  { %v1978_v56 = vpop.eup %1977 }
 0x584   :  { %v642_v57 = vadd.f32 1.0, %v1978_v56  ;;  %v1980_v59 = vpop.eup %1979  ;;  %v2470_v56 = vld [vmem:[%s2542_s1] sm:$0xff] }
 0x585   :  { %vm346_vm5 = vcmp.gt.s32.totalorder %v2470_v56, 0  ;;  %vm554_vm6 = vcmp.gt.s32.totalorder %v2470_v56, 2  ;;  %vm450_vm7 = vcmp.gt.s32.totalorder %v2470_v56, 1  ;;  %vm762_vm8 = vcmp.gt.s32.totalorder %v2470_v56, 4 }
 0x586   :  { %v643_v58 = vmul.f32 0.5, %v642_v57  ;;  %v1220_v57 = vsel %vm346_vm5, 1.0, %v2108_v1  ;;  %vm658_vm9 = vcmp.gt.s32.totalorder %v2470_v56, 3  ;;  %vm970_vm10 = vcmp.gt.s32.totalorder %v2470_v56, 6 }
 0x587   :  { %vm866_vm11 = vcmp.gt.s32.totalorder %v2470_v56, 5  ;;  %vm1074_vm12 = vcmp.gt.s32.totalorder %v2470_v56, 7 }
 0x588   :  { %v644_v62 = vsel %vm2295_vm4, %v1980_v59, %v643_v58  ;;  %v349_v59 = vsub.f32 1.0, %v1220_v57 }
 0x589   :  { %648 = vrot.lane.b32.xlu0 %v644_v62, %s2111_s19  ;;  %645 = vrot.lane.b32.xlu1 %v644_v62, %s2110_s18 }
 0x58d   :  { %650 = vrot.lane.b32.xlu1 %v644_v62, %s2109_s3 }
 0x5fb   :  { %v649_v61 = vpop.permute.xlu0 %648  ;;  %v646_v6 = vpop.permute.xlu1 %645 }
 0x5fc   :  { %v652_v8 = vmul.f32 %v649_v61, %v549_v47  ;;  %v647_v9 = vmul.f32 %v646_v6, %v644_v62  ;;  %v1222_v61 = vsel %vm554_vm6, 1.0, %v2108_v1  ;;  %v1221_v6 = vsel %vm450_vm7, 1.0, %v2108_v1 }
 0x5fe   :  { %v653_v10 = vadd.f32 %v652_v8, %v647_v9 }
 0x5ff   :  { %v651_v12 = vpop.permute.xlu1 %650 }
 0x600   :  { %1981 = vtanh.f32 %v653_v10 }
 0x60a   :  { %v1982_v11 = vpop.eup %1981 }
 0x60b   :  { %v2403_v13 = vmul.f32 %v1982_v11, %v651_v12  ;;  %v557_v11 = vsub.f32 1.0, %v1222_v61  ;;  %v453_v12 = vsub.f32 1.0, %v1221_v6  ;;  %v1110_v61 = vld [vmem:[#allocation11 + $0x48] sm:$0xff] }
 0x60d   :  { %1582 = vmatmul.mubr.f32.vlgmr.msra.gmra.mrb[4].mxu1 %v2403_v13 }
 0x60e   :  { %1874 = vmatpush3.bf16.msra.mxu1 %v2209_v5  ;;  %1651 = vmatprep.mubr.msk.f32.mxu1 %vm2107_vm0, %v2108_v1 }
 0x60f   :  { %1875 = vmatprep.subr.bf16.mxu1 %v2106_v0 }
 0x612   :  { %1877 = vmatpush3.bf16.msra.mxu1 %v2212_v7 }
 0x613   :  { %1878 = vmatprep.subr.bf16.mxu1 %v2106_v0 }
 0x616   :  { %1880 = vmatpush3.bf16.msra.mxu1 %v2223_v14 }
 0x617   :  { %1881 = vmatprep.subr.bf16.mxu1 %v2106_v0 }
 0x61a   :  { %1883 = vmatpush3.bf16.msra.mxu1 %v2228_v18 }
 0x61b   :  { %1884 = vmatprep.subr.bf16.mxu1 %v2106_v0 }
 0x61e   :  { %1886 = vmatpush3.bf16.msra.mxu1 %v2235_v21 }
 0x61f   :  { %1887 = vmatprep.subr.bf16.mxu1 %v2106_v0 }
 0x622   :  { %1889 = vmatpush3.bf16.msra.mxu1 %v2241_v24 }
 0x623   :  { %1890 = vmatprep.subr.bf16.mxu1 %v2106_v0 }
 0x626   :  { %1892 = vmatpush3.bf16.msra.mxu1 %v2247_v27 }
 0x627   :  { %1893 = vmatprep.subr.bf16.mxu1 %v2106_v0 }
 0x62a   :  { %1895 = vmatpush3.bf16.msra.mxu1 %v2253_v30 }
 0x62b   :  { %1920 = vmatprep.subr.bf16.mxu1 %v2106_v0 }
 0x6e0   :  { %v738_v16 = vpop.f32.mrb[4].mxu1 }
 0x6e1   :  { %v742_v17 = vadd.f32 %v738_v16, %v204_v15  ;;  %v1583_v19 = vpop.f32.mrb[5].mxu1  ;;  %v558_v15 = vmul.f32 -1e+30, %v557_v11  ;;  %v454_v16 = vmul.f32 -1e+30, %v453_v12  ;;  %v1113_v12 = vld [vmem:[#allocation11 + $0x60] sm:$0xff] }
 0x6e3   :  { %v744_v20 = vmul.f32 0.5, %v742_v17 }
 0x6e5   :  { %1983 = vtanh.f32 %v744_v20 }
 0x6e6   :  { %1985 = vtanh.f32 %v742_v17 }
 0x6ef   :  { %v1984_v22 = vpop.eup %1983 }
 0x6f0   :  { %v746_v23 = vadd.f32 1.0, %v1984_v22  ;;  %v1986_v26 = vpop.eup %1985 }
 0x6f2   :  { %v747_v25 = vmul.f32 0.5, %v746_v23 }
 0x6f4   :  { %v748_v28 = vsel %vm2295_vm4, %v1986_v26, %v747_v25 }
 0x6f5   :  { %752 = vrot.lane.b32.xlu1 %v748_v28, %s2111_s19  ;;  %749 = vrot.lane.b32.xlu0 %v748_v28, %s2110_s18 }
 0x6f9   :  { %754 = vrot.lane.b32.xlu0 %v748_v28, %s2109_s3 }
 0x767   :  { %v753_v2 = vpop.permute.xlu1 %752  ;;  %v750_v31 = vpop.permute.xlu0 %749 }
 0x768   :  { %v756_v32 = vmul.f32 %v753_v2, %v653_v10  ;;  %v751_v34 = vmul.f32 %v750_v31, %v748_v28  ;;  %v350_v10 = vmul.f32 -1e+30, %v349_v59  ;;  %v219_v2 = vadd.f32 %v2337_v3, %v2290_v33  ;;  %v1106_v3 = vld [vmem:[#allocation11 + $0x28] sm:$0xff] }
 0x76a   :  { %v757_v35 = vadd.f32 %v756_v32, %v751_v34 }
 0x76b   :  { %v755_v37 = vpop.permute.xlu0 %754 }
 0x76c   :  { %1987 = vtanh.f32 %v757_v35 }
 0x776   :  { %v1988_v36 = vpop.eup %1987 }
 0x777   :  { %v2431_v38 = vmul.f32 %v1988_v36, %v755_v37  ;;  %v1101_v36 = vld [vmem:[#allocation11] sm:$0xff]  ;;  %v1102_v37 = vld [vmem:[#allocation11 + $0x8] sm:$0xff] }
 0x779   :  { %1617 = vmatmul.mubr.f32.vlgmr.msra.gmra.mrb[12].mxu0 %v2431_v38 }
 0x77a   :  { %1898 = vmatpush3.bf16.msra.mxu0 %v2209_v5  ;;  %1686 = vmatprep.mubr.msk.f32.mxu0 %vm2107_vm0, %v2108_v1  ;;  %v209_v5 = vadd.f32 %v2333_v63, %v2290_v33  ;;  %v1105_v33 = vld [vmem:[#allocation11 + $0x20] sm:$0xff] }
 0x77b   :  { %1899 = vmatprep.subr.bf16.mxu0 %v2106_v0 }
 0x77e   :  { %1901 = vmatpush3.bf16.msra.mxu0 %v2212_v7 }
 0x77f   :  { %1902 = vmatprep.subr.bf16.mxu0 %v2106_v0 }
 0x782   :  { %1904 = vmatpush3.bf16.msra.mxu0 %v2223_v14 }
 0x783   :  { %1905 = vmatprep.subr.bf16.mxu0 %v2106_v0 }
 0x786   :  { %1907 = vmatpush3.bf16.msra.mxu0 %v2228_v18 }
 0x787   :  { %1908 = vmatprep.subr.bf16.mxu0 %v2106_v0 }
 0x78a   :  { %1910 = vmatpush3.bf16.msra.mxu0 %v2235_v21 }
 0x78b   :  { %1911 = vmatprep.subr.bf16.mxu0 %v2106_v0 }
 0x78e   :  { %1913 = vmatpush3.bf16.msra.mxu0 %v2241_v24 }
 0x78f   :  { %1914 = vmatprep.subr.bf16.mxu0 %v2106_v0 }
 0x792   :  { %1916 = vmatpush3.bf16.msra.mxu0 %v2247_v27 }
 0x793   :  { %1917 = vmatprep.subr.bf16.mxu0 %v2106_v0 }
 0x796   :  { %1919 = vmatpush3.bf16.msra.mxu0 %v2253_v30 }
 0x84c   :  { %v842_v7 = vpop.f32.mrb[12].mxu0 }
 0x84d   :  { %v846_v14 = vadd.f32 %v842_v7, %v209_v5  ;;  %v1618_v18 = vpop.f32.mrb[13].mxu0  ;;  %v1921_v5 = vpack.c.bf16 %v1102_v37, %v1101_v36  ;;  %v1103_v7 = vld [vmem:[#allocation11 + $0x10] sm:$0xff] }
 0x84f   :  { %v848_v39 = vmul.f32 0.5, %v846_v14 }
 0x851   :  { %1989 = vtanh.f32 %v848_v39  ;;  %v1224_v39 = vsel %vm762_vm8, 1.0, %v2108_v1 }
 0x852   :  { %1991 = vtanh.f32 %v846_v14  ;;  %v1104_v14 = vld [vmem:[#allocation11 + $0x18] sm:$0xff] }
 0x853   :  { %v1924_v18 = vpack.c.bf16 %v1104_v14, %v1103_v7 }
 0x85b   :  { %v1990_v21 = vpop.eup %1989 }
 0x85c   :  { %v850_v40 = vadd.f32 1.0, %v1990_v21  ;;  %v1992_v41 = vpop.eup %1991  ;;  %v1223_v21 = vsel %vm658_vm9, 1.0, %v2108_v1 }
 0x85e   :  { %v851_v24 = vmul.f32 0.5, %v850_v40 }
 0x860   :  { %v852_v27 = vsel %vm2295_vm4, %v1992_v41, %v851_v24  ;;  %v1927_v41 = vpack.c.bf16 %v1106_v3, %v1105_v33 }
 0x861   :  { %856 = vrot.lane.b32.xlu0 %v852_v27, %s2111_s19  ;;  %853 = vrot.lane.b32.xlu1 %v852_v27, %s2110_s18 }
 0x865   :  { %858 = vrot.lane.b32.xlu1 %v852_v27, %s2109_s3 }
 0x8d3   :  { %v857_v30 = vpop.permute.xlu0 %856  ;;  %v854_v63 = vpop.permute.xlu1 %853 }
 0x8d4   :  { %v860_v42 = vmul.f32 %v857_v30, %v757_v35  ;;  %v855_v43 = vmul.f32 %v854_v63, %v852_v27  ;;  %v765_v27 = vsub.f32 1.0, %v1224_v39  ;;  %v661_v30 = vsub.f32 1.0, %v1223_v21 }
 0x8d5   :  { %v1226_v63 = vsel %vm970_vm10, 1.0, %v2108_v1 }
 0x8d6   :  { %v861_v44 = vadd.f32 %v860_v42, %v855_v43  ;;  %v1107_v42 = vld [vmem:[#allocation11 + $0x30] sm:$0xff]  ;;  %v1108_v43 = vld [vmem:[#allocation11 + $0x38] sm:$0xff] }
 0x8d7   :  { %v859_v47 = vpop.permute.xlu1 %858 }
 0x8d8   :  { %1993 = vtanh.f32 %v861_v44 }
 0x8e2   :  { %v1994_v45 = vpop.eup %1993 }
 0x8e3   :  { %v2458_v48 = vmul.f32 %v1994_v45, %v859_v47  ;;  %v1225_v45 = vsel %vm866_vm11, 1.0, %v2108_v1 }
 0x8e4   :  { %v869_v57 = vsub.f32 1.0, %v1225_v45 }
 0x8e5   :  { %1652 = vmatmul.mubr.f32.vlgmr.msra.gmra.mrb[6].mxu1 %v2458_v48 }
 0x8e6   :  { %1721 = vmatprep.mubr.msk.f32.mxu1 %vm2107_vm0, %v2108_v1  ;;  %1922 = vmatpush3.bf16.msra.mxu1 %v1921_v5  ;;  %v870_v46 = vmul.f32 -1e+30, %v869_v57 }
 0x8e7   :  { %1923 = vmatprep.subr.bf16.mxu1 %v2106_v0 }
 0x8ea   :  { %1925 = vmatpush3.bf16.msra.mxu1 %v1924_v18 }
 0x8eb   :  { %1926 = vmatprep.subr.bf16.mxu1 %v2106_v0 }
 0x8ee   :  { %1928 = vmatpush3.bf16.msra.mxu1 %v1927_v41 }
 0x8ef   :  { %1929 = vmatprep.subr.bf16.mxu1 %v2106_v0 }
 0x9b8   :  { %v946_v52 = vpop.f32.mrb[6].mxu1 }
 0x9b9   :  { %v950_v53 = vadd.f32 %v946_v52, %v214_v51  ;;  %v1653_v54 = vpop.f32.mrb[7].mxu1  ;;  %v973_v52 = vsub.f32 1.0, %v1226_v63 }
 0x9ba   :  { %v766_v54 = vmul.f32 -1e+30, %v765_v27 }
 0x9bb   :  { %v952_v55 = vmul.f32 0.5, %v950_v53 }
 0x9bd   :  { %1995 = vtanh.f32 %v952_v55  ;;  %v662_v55 = vmul.f32 -1e+30, %v661_v30 }
 0x9be   :  { %1997 = vtanh.f32 %v950_v53  ;;  %v1930_v53 = vpack.c.bf16 %v1108_v43, %v1107_v42 }
 0x9c0   :  { %1931 = vmatpush3.bf16.msra.mxu1 %v1930_v53 }
 0x9c1   :  { %1932 = vmatprep.subr.bf16.mxu1 %v2106_v0 }
 0x9c7   :  { %v1996_v58 = vpop.eup %1995 }
 0x9c8   :  { %v954_v4 = vadd.f32 1.0, %v1996_v58  ;;  %v1998_v8 = vpop.eup %1997  ;;  %v1227_v58 = vsel %vm1074_vm12, 1.0, %v2108_v1  ;;  %v1095_v1 = vsel %vm346_vm5, 1, %v2112_v49 }
 0x9c9   :  { %v1077_v59 = vsub.f32 1.0, %v1227_v58 }
 0x9ca   :  { %v955_v62 = vmul.f32 0.5, %v954_v4  ;;  %v974_v4 = vmul.f32 -1e+30, %v973_v52 }
 0x9cc   :  { %v956_v9 = vsel %vm2295_vm4, %v1998_v8, %v955_v62  ;;  %v1109_v62 = vld [vmem:[#allocation11 + $0x40] sm:$0xff]  ;;  %v1078_v8 = vmul.f32 -1e+30, %v1077_v59 }
 0x9cd   :  { %960 = vrot.lane.b32.xlu1 %v956_v9, %s2111_s19  ;;  %957 = vrot.lane.b32.xlu0 %v956_v9, %s2110_s18  ;;  %v1933_v6 = vpack.c.bf16 %v1110_v61, %v1109_v62 }
 0x9cf   :  { %1934 = vmatpush3.bf16.msra.mxu1 %v1933_v6 }
 0x9d0   :  { %1935 = vmatprep.subr.bf16.mxu1 %v2106_v0 }
 0x9d1   :  { %353 = vperm.xlu1 %1957, %v350_v10   ;;  %962 = vrot.lane.b32.xlu0 %v956_v9, %s2109_s3  ;;  %v1112_v10 = vld [vmem:[#allocation11 + $0x58] sm:$0xff] }
 0x9d5   :  { %561 = vperm.xlu1 %1957, %v558_v15   ;;  %457 = vperm.xlu0 %1958, %v454_v16   ;;  %v1114_v15 = vld [vmem:[#allocation11 + $0x68] sm:$0xff] }
 0x9d6   :  { %v1939_v16 = vpack.c.bf16 %v1114_v15, %v1113_v12 }
 0xa3f   :  { %v961_v17 = vpop.permute.xlu1 %960  ;;  %v958_v19 = vpop.permute.xlu0 %957 }
 0xa40   :  { %v964_v20 = vmul.f32 %v961_v17, %v861_v44  ;;  %v959_v22 = vmul.f32 %v958_v19, %v956_v9  ;;  %v1111_v9 = vld [vmem:[#allocation11 + $0x50] sm:$0xff]  ;;  %v1116_v19 = vld [vmem:[#allocation11 + $0x78] sm:$0xff] }
 0xa41   :  { %v1936_v11 = vpack.c.bf16 %v1112_v10, %v1111_v9  ;;  %v1115_v17 = vld [vmem:[#allocation11 + $0x70] sm:$0xff] }
 0xa42   :  { %v2485_v23 = vadd.f32 %v964_v20, %v959_v22  ;;  %v1942_v56 = vpack.c.bf16 %v1116_v19, %v1115_v17 }
 0xa43   :  { %v963_v26 = vpop.permute.xlu0 %962  ;;  %1937 = vmatpush3.bf16.msra.mxu1 %v1936_v11 }
 0xa44   :  { %1999 = vtanh.f32 %v2485_v23  ;;  %1938 = vmatprep.subr.bf16.mxu1 %v2106_v0 }
 0xa47   :  { %1940 = vmatpush3.bf16.msra.mxu1 %v1939_v16 }
 0xa48   :  { %1941 = vmatprep.subr.bf16.mxu1 %v2106_v0 }
 0xa4b   :  { %1943 = vmatpush3.bf16.msra.mxu1 %v1942_v56 }
 0xa4e   :  { %v2000_v25 = vpop.eup %1999 }
 0xa4f   :  { %v2488_v28 = vmul.f32 %v2000_v25, %v963_v26 }
 0xa50   :  { %v354_v49 = vpop.permute.xlu1 %353 }
 0xa51   :  { %1687 = vmatmul.mubr.f32.vlgmr.msra.gmra.mrb[14].mxu0 %v2488_v28 }
 0xa54   :  { %v562_v20 = vpop.permute.xlu1 %561  ;;  %v458_v22 = vpop.permute.xlu0 %457 }
 0xa55   :  { %v564_v0 = vadd.f32 %v562_v20, %v2375_v50 }
 0xb24   :  { %v1050_v31 = vpop.f32.mrb[14].mxu0 }
 0xb25   :  { %v1054_v32 = vadd.f32 %v1050_v31, %v219_v2  ;;  %v1688_v34 = vpop.f32.mrb[15].mxu0  ;;  %v460_v2 = vadd.f32 %v458_v22, %v2348_v29 }
 0xb26   :  { %v356_v34 = vadd.f32 %v354_v49, %v2310_v60 }
 0xb27   :  { %v1056_v35 = vmul.f32 0.5, %v1054_v32 }
 0xb29   :  { %2001 = vtanh.f32 %v1056_v35  ;;  %v461_v35 = vmax.f32 %v356_v34, %v460_v2 }
 0xb2a   :  { %2003 = vtanh.f32 %v1054_v32 }
 0xb2b   :  { %v565_v5 = vmax.f32 %v461_v35, %v564_v0 }
 0xb33   :  { %v2002_v40 = vpop.eup %2001 }
 0xb34   :  { %v1058_v24 = vadd.f32 1.0, %v2002_v40  ;;  %v2004_v47 = vpop.eup %2003 }
 0xb36   :  { %v1059_v44 = vmul.f32 0.5, %v1058_v24 }
 0xb38   :  { %v1060_v51 = vsel %vm2295_vm4, %v2004_v47, %v1059_v44 }
 0xb39   :  { %1064 = vrot.lane.b32.xlu0 %v1060_v51, %s2111_s19  ;;  %1061 = vrot.lane.b32.xlu1 %v1060_v51, %s2110_s18 }
 0xb3d   :  { %769 = vperm.xlu0 %1958, %v766_v54   ;;  %665 = vperm.xlu1 %1957, %v662_v55  }
 0xb41   :  { %977 = vperm.xlu0 %1958, %v974_v4   ;;  %873 = vperm.xlu1 %1957, %v870_v46  }
 0xb45   :  { %1097 = vperm.xlu0 %1958, %v1095_v1   ;;  %1081 = vperm.xlu1 %1957, %v1078_v8  }
 0xb49   :  { %1066 = vrot.lane.b32.xlu1 %v1060_v51, %s2109_s3 }
 0xbab   :  { %v1065_v25 = vpop.permute.xlu0 %1064  ;;  %v1062_v26 = vpop.permute.xlu1 %1061 }
 0xbac   :  { %v1068_v31 = vmul.f32 %v1065_v25, %v2485_v23  ;;  %v1063_v32 = vmul.f32 %v1062_v26, %v1060_v51 }
 0xbae   :  { %v1069_v36 = vadd.f32 %v1068_v31, %v1063_v32 }
 0xbb0   :  { %2005 = vtanh.f32 %v1069_v36 }
 0xbba   :  { %v2006_v40 = vpop.eup %2005 }
 0xbbc   :  { %v666_v37 = vpop.permute.xlu1 %665  ;;  %v770_v14 = vpop.permute.xlu0 %769 }
 0xbbd   :  { %v668_v7 = vadd.f32 %v666_v37, %v2403_v13  ;;  %v772_v3 = vadd.f32 %v770_v14, %v2431_v38  ;;  %v1228_v38 = vld [vmem:[%s2547_s6] ss:$0 sm:$0xff] }
 0xbbf   :  { %v669_v18 = vmax.f32 %v565_v5, %v668_v7 }
 0xbc0   :  { %v874_v33 = vpop.permute.xlu1 %873  ;;  %v978_v21 = vpop.permute.xlu0 %977 }
 0xbc1   :  { %v773_v29 = vmax.f32 %v669_v18, %v772_v3  ;;  %v876_v23 = vadd.f32 %v874_v33, %v2458_v48  ;;  %v980_v50 = vadd.f32 %v978_v21, %v2488_v28 }
 0xbc3   :  { %v877_v60 = vmax.f32 %v773_v29, %v876_v23 }
 0xbc4   :  { %v1082_v39 = vpop.permute.xlu1 %1081  ;;  %v1098_v30 = vpop.permute.xlu0 %1097 }
 0xbc5   :  { %v981_v27 = vmax.f32 %v877_v60, %v980_v50  ;;  %vm1099_vm13 = vcmp.eq.s32.totalorder %v1098_v30, 1 }
 0xbc8   :  { %v1067_v24 = vpop.permute.xlu1 %1066 }
 0xbc9   :  { %v1071_v41 = vmul.f32 %v2006_v40, %v1067_v24 }
 0xbcb   :  { %v1084_v13 = vadd.f32 %v1082_v39, %v1071_v41 }
 0xbcd   :  { %v1085_v63 = vmax.f32 %v981_v27, %v1084_v13 }
 0xbcf   :  { %1722 = vmatmul.mubr.msk.f32.vlgmr.msra.gmra.mrb[8].mxu1 %vm1099_vm13, %v1085_v63 }
 0xca2   :  { %v1190_v48 = vpop.f32.mrb[8].mxu1 }
 0xca3   :  { %v1191_v42 = vadd.f32 %v1228_v38, %v1190_v48  ;;  %v1723_v43 = vpop.f32.mrb[9].mxu1 }
 0xca5   :  { %1194 = vst [vmem:[#allocation12] sm:$0xff] %v1191_v42 }
 0xca6   :  { %2084 = shalt.err (!%p2081_p0)
}
 0xca7   :  { %s2085_s28 = scalar_lea.hbm %s2548_s7, 128 }
 0xca8   :  { %p2086_p1 = scmp.ne.s32.totalorder %s2548_s7, %s2085_s28  ;;  %p2089_p2 = scmp.lt.u32.totalorder %s2085_s28, %s2548_s7 }
 0xcaa   :  { %p2091_p3 = pnand %p2089_p2, %p2086_p1 }
 0xcac   :  { %2094 = shalt.err (!%p2091_p3)
}
 0xcad   :  { %1204 = dma.vmem_to_hbm [thread:$0]  %s1202_s24, 128, %s2548_s7, [#allocation8]  }
 0xcae   :  { %2099 = dma.done.wait [#allocation8], 128  }
 0xcaf   :  { %2100 = vsyncadd [#allocation8], 4294967168 }
 0xcb0   :  { %1208 = vsyncpa [#allocation7], 1 }
 0xcb1   :  { %1209 = vsyncpa [#allocation10], 1 }
 0xcb2   :  { %1210 = vsyncpa [#allocation8], 1 }

</bundles_post_ra>
